<compile_context>
chip_gen: v7x
topology: tpu7x:2x2x1
jax: 0.10.0
libtpu: 0.0.40
codegen_flags: <defaults>
</compile_context>

<pallas_src>
import functools

import jax
import jax.numpy as jnp
from jax.experimental import pallas as pl
from jax.experimental.pallas import tpu as pltpu

EPS = 1e-5  # nn.BatchNorm1d default


def _mlp_kernel(x_ref, w0_ref, w1_ref, w2_ref, w3_ref, w4_ref, gb_ref, b4_ref, o_ref):
    inv_b = 1.0 / x_ref.shape[0]
    gb = gb_ref[...]  # (8, 512): rows 0..3 = gamma0..3, rows 4..7 = beta0..3

    def bn_relu(h, layer):
        # BatchNorm1d, training mode (batch mean, biased batch variance),
        # fused into one multiply-add per element.
        gamma = gb[layer:layer + 1, :]
        beta = gb[4 + layer:5 + layer, :]
        mean = jnp.sum(h, axis=0, keepdims=True) * inv_b
        mean_sq = jnp.sum(h * h, axis=0, keepdims=True) * inv_b
        var = mean_sq - mean * mean
        scale = gamma * jax.lax.rsqrt(var + EPS)
        shift = beta - mean * scale
        return jnp.maximum(h * scale + shift, 0.0)

    # bf16 x bf16 MXU matmuls, f32 accumulation; BN/ReLU in f32.
    h = jnp.dot(x_ref[...], w0_ref[...], preferred_element_type=jnp.float32)
    h = bn_relu(h, 0)
    h = jnp.dot(h.astype(jnp.bfloat16), w1_ref[...], preferred_element_type=jnp.float32)
    h = bn_relu(h, 1)
    h = jnp.dot(h.astype(jnp.bfloat16), w2_ref[...], preferred_element_type=jnp.float32)
    h = bn_relu(h, 2)
    h = jnp.dot(h.astype(jnp.bfloat16), w3_ref[...], preferred_element_type=jnp.float32)
    h = bn_relu(h, 3)
    logits = (jnp.dot(h.astype(jnp.bfloat16), w4_ref[...],
                      preferred_element_type=jnp.float32) + b4_ref[...])
    o_ref[...] = jax.nn.sigmoid(logits)


def prepare_params(params):
    """Pack the 18 PyTorch-style f32 params into the kernel's 7 arrays.

    - W0..W4 cast to bf16 (halves weight HBM traffic, single MXU pass).
    - b0..b3 dropped (cancelled exactly by training-mode BN mean subtraction).
    - gamma0..3 / beta0..3 packed into one (8, 512) f32 array (one DMA).
    - b4 kept in f32.
    """
    (w0, _b0, g0, be0,
     w1, _b1, g1, be1,
     w2, _b2, g2, be2,
     w3, _b3, g3, be3,
     w4, b4) = params
    ws = tuple(w.astype(jnp.bfloat16) for w in (w0, w1, w2, w3, w4))
    gb = jnp.concatenate([g0, g1, g2, g3, be0, be1, be2, be3], axis=0).astype(jnp.float32)
    return ws + (gb, b4.astype(jnp.float32))


@functools.partial(jax.jit, static_argnames=())
def face_mi_model_large(x, packed):
    """x: (B, input_size) f32.  packed: output of prepare_params()."""
    w0, w1, w2, w3, w4, gb, b4 = packed
    B = x.shape[0]
    out_features = w4.shape[-1]

    vmem = pl.BlockSpec(memory_space=pltpu.MemorySpace.VMEM)
    return pl.pallas_call(
        _mlp_kernel,
        out_shape=jax.ShapeDtypeStruct((B, out_features), jnp.float32),
        in_specs=[vmem] * 8,
        out_specs=vmem,
    )(x.astype(jnp.bfloat16), w0, w1, w2, w3, w4, gb, b4)


def init_params(key, input_size, output_size, hidden=512):
    """Deterministic synthetic parameters matching FaceMIModelLarge's shapes."""
    dims = [(input_size, hidden), (hidden, hidden), (hidden, hidden),
            (hidden, hidden), (hidden, output_size)]
    params = []
    keys = jax.random.split(key, 32)
    ki = 0
    for li, (din, dout) in enumerate(dims):
        w = 0.05 * jax.random.normal(keys[ki], (din, dout), jnp.float32); ki += 1
        b = 0.05 * jax.random.normal(keys[ki], (1, dout), jnp.float32); ki += 1
        params += [w, b]
        if li < 4:  # BatchNorm1d after the first four linears
            gamma = 1.0 + 0.1 * jax.random.normal(keys[ki], (1, dout), jnp.float32); ki += 1
            beta = 0.1 * jax.random.normal(keys[ki], (1, dout), jnp.float32); ki += 1
            params += [gamma, beta]
    return tuple(params)


def _reference(x, params):
    """Pure-JAX reference of the module's forward pass.

    Uses the same bf16 compute dtype for the matmuls as the kernel (so the
    comparison isolates kernel correctness), but keeps the original structure:
    biases b0..b3 included, textbook training-mode BatchNorm formula.
    """
    (w0, b0, g0, be0,
     w1, b1, g1, be1,
     w2, b2, g2, be2,
     w3, b3, g3, be3,
     w4, b4) = params

    def dot_bf16(a, w):
        return jnp.dot(a.astype(jnp.bfloat16), w.astype(jnp.bfloat16),
                       preferred_element_type=jnp.float32)

    def bn_relu(h, g, b):
        m = jnp.mean(h, axis=0, keepdims=True)
        v = jnp.mean((h - m) ** 2, axis=0, keepdims=True)
        return jnp.maximum((h - m) / jnp.sqrt(v + EPS) * g + b, 0.0)

    h = bn_relu(dot_bf16(x, w0) + b0, g0, be0)
    h = bn_relu(dot_bf16(h, w1) + b1, g1, be1)
    h = bn_relu(dot_bf16(h, w2) + b2, g2, be2)
    h = bn_relu(dot_bf16(h, w3) + b3, g3, be3)
    return jax.nn.sigmoid(dot_bf16(h, w4) + b4)


if __name__ == "__main__":
    B = 16
    INPUT_SIZE = 128
    OUTPUT_SIZE = 16

    root = jax.random.PRNGKey(0)
    k_x, k_p = jax.random.split(root)

    x = jax.random.normal(k_x, (B, INPUT_SIZE), jnp.float32)
    params = init_params(k_p, INPUT_SIZE, OUTPUT_SIZE)
    packed = prepare_params(params)

    out = face_mi_model_large(x, packed)
    out = jax.block_until_ready(out)

    ref = _reference(x, params)
    assert out.shape == (B, OUTPUT_SIZE)
    # Differences vs the reference come only from the (mathematically exact)
    # b0..b3 cancellation and the fused E[h^2]-mean^2 variance formula.
    assert jnp.allclose(out, ref, atol=2e-3, rtol=2e-3), "mismatch vs reference"

    print("KERNEL_OK")
</pallas_src>

<mosaic_0001>
module attributes {stable_mosaic.version = 11 : i64} {
  func.func @_mlp_kernel(%arg0: memref<16x128xbf16, #tpu.memory_space<vmem>>, %arg1: memref<128x512xbf16, #tpu.memory_space<vmem>>, %arg2: memref<512x512xbf16, #tpu.memory_space<vmem>>, %arg3: memref<512x512xbf16, #tpu.memory_space<vmem>>, %arg4: memref<512x512xbf16, #tpu.memory_space<vmem>>, %arg5: memref<512x16xbf16, #tpu.memory_space<vmem>>, %arg6: memref<8x512xf32, #tpu.memory_space<vmem>>, %arg7: memref<1x16xf32, #tpu.memory_space<vmem>>, %arg8: memref<16x16xf32, #tpu.memory_space<vmem>>) attributes {dimension_semantics = [], scalar_prefetch = 0 : i64, scratch_operands = 0 : i64, tpu.core_type = #tpu.core_type<tc>} {
    %c0 = arith.constant 0 : index
    %c0_0 = arith.constant 0 : index
    %0 = vector.load %arg6[%c0, %c0_0] : memref<8x512xf32, #tpu.memory_space<vmem>>, vector<8x512xf32>
    %c0_1 = arith.constant 0 : index
    %c0_2 = arith.constant 0 : index
    %1 = vector.load %arg0[%c0_1, %c0_2] : memref<16x128xbf16, #tpu.memory_space<vmem>>, vector<16x128xbf16>
    %c0_3 = arith.constant 0 : index
    %c0_4 = arith.constant 0 : index
    %2 = vector.load %arg1[%c0_3, %c0_4] : memref<128x512xbf16, #tpu.memory_space<vmem>>, vector<128x512xbf16>
    %cst = arith.constant dense<0.000000e+00> : vector<16x512xf32>
    %3 = tpu.matmul %1, %2, %cst {dimension_numbers = #tpu.dot_dimension_numbers<[1], [0], [0], [1], [0, 0, 1, 1], [], []>} : vector<16x128xbf16>, vector<128x512xbf16>, vector<16x512xf32> -> vector<16x512xf32>
    %4 = vector.extract_strided_slice %0 {offsets = [0, 0], sizes = [1, 512], strides = [1, 1]} : vector<8x512xf32> to vector<1x512xf32>
    %5 = vector.extract_strided_slice %0 {offsets = [4, 0], sizes = [1, 512], strides = [1, 1]} : vector<8x512xf32> to vector<1x512xf32>
    %cst_5 = arith.constant dense<0.000000e+00> : vector<512xf32>
    %6 = vector.multi_reduction <add>, %3, %cst_5 [0] : vector<16x512xf32> to vector<512xf32>
    %7 = vector.shape_cast %6 : vector<512xf32> to vector<1x512xf32>
    %cst_6 = arith.constant 6.250000e-02 : f32
    %8 = vector.broadcast %cst_6 : f32 to vector<1x512xf32>
    %9 = arith.mulf %7, %8 : vector<1x512xf32>
    %10 = arith.mulf %3, %3 : vector<16x512xf32>
    %cst_7 = arith.constant dense<0.000000e+00> : vector<512xf32>
    %11 = vector.multi_reduction <add>, %10, %cst_7 [0] : vector<16x512xf32> to vector<512xf32>
    %12 = vector.shape_cast %11 : vector<512xf32> to vector<1x512xf32>
    %cst_8 = arith.constant 6.250000e-02 : f32
    %13 = vector.broadcast %cst_8 : f32 to vector<1x512xf32>
    %14 = arith.mulf %12, %13 : vector<1x512xf32>
    %15 = arith.mulf %9, %9 : vector<1x512xf32>
    %16 = arith.subf %14, %15 : vector<1x512xf32>
    %cst_9 = arith.constant 9.99999974E-6 : f32
    %17 = vector.broadcast %cst_9 : f32 to vector<1x512xf32>
    %18 = arith.addf %16, %17 : vector<1x512xf32>
    %19 = math.rsqrt %18 : vector<1x512xf32>
    %20 = arith.mulf %4, %19 : vector<1x512xf32>
    %21 = arith.mulf %9, %20 : vector<1x512xf32>
    %22 = arith.subf %5, %21 : vector<1x512xf32>
    %23 = vector.broadcast %20 : vector<1x512xf32> to vector<16x512xf32>
    %24 = arith.mulf %3, %23 : vector<16x512xf32>
    %25 = vector.broadcast %22 : vector<1x512xf32> to vector<16x512xf32>
    %26 = arith.addf %24, %25 : vector<16x512xf32>
    %cst_10 = arith.constant 0.000000e+00 : f32
    %27 = vector.broadcast %cst_10 : f32 to vector<16x512xf32>
    %28 = arith.maximumf %26, %27 : vector<16x512xf32>
    %29 = arith.truncf %28 : vector<16x512xf32> to vector<16x512xbf16>
    %c0_11 = arith.constant 0 : index
    %c0_12 = arith.constant 0 : index
    %30 = vector.load %arg2[%c0_11, %c0_12] : memref<512x512xbf16, #tpu.memory_space<vmem>>, vector<512x512xbf16>
    %cst_13 = arith.constant dense<0.000000e+00> : vector<16x512xf32>
    %31 = tpu.matmul %29, %30, %cst_13 {dimension_numbers = #tpu.dot_dimension_numbers<[1], [0], [0], [1], [0, 0, 1, 1], [], []>} : vector<16x512xbf16>, vector<512x512xbf16>, vector<16x512xf32> -> vector<16x512xf32>
    %32 = vector.extract_strided_slice %0 {offsets = [1, 0], sizes = [1, 512], strides = [1, 1]} : vector<8x512xf32> to vector<1x512xf32>
    %33 = vector.extract_strided_slice %0 {offsets = [5, 0], sizes = [1, 512], strides = [1, 1]} : vector<8x512xf32> to vector<1x512xf32>
    %cst_14 = arith.constant dense<0.000000e+00> : vector<512xf32>
    %34 = vector.multi_reduction <add>, %31, %cst_14 [0] : vector<16x512xf32> to vector<512xf32>
    %35 = vector.shape_cast %34 : vector<512xf32> to vector<1x512xf32>
    %cst_15 = arith.constant 6.250000e-02 : f32
    %36 = vector.broadcast %cst_15 : f32 to vector<1x512xf32>
    %37 = arith.mulf %35, %36 : vector<1x512xf32>
    %38 = arith.mulf %31, %31 : vector<16x512xf32>
    %cst_16 = arith.constant dense<0.000000e+00> : vector<512xf32>
    %39 = vector.multi_reduction <add>, %38, %cst_16 [0] : vector<16x512xf32> to vector<512xf32>
    %40 = vector.shape_cast %39 : vector<512xf32> to vector<1x512xf32>
    %cst_17 = arith.constant 6.250000e-02 : f32
    %41 = vector.broadcast %cst_17 : f32 to vector<1x512xf32>
    %42 = arith.mulf %40, %41 : vector<1x512xf32>
    %43 = arith.mulf %37, %37 : vector<1x512xf32>
    %44 = arith.subf %42, %43 : vector<1x512xf32>
    %cst_18 = arith.constant 9.99999974E-6 : f32
    %45 = vector.broadcast %cst_18 : f32 to vector<1x512xf32>
    %46 = arith.addf %44, %45 : vector<1x512xf32>
    %47 = math.rsqrt %46 : vector<1x512xf32>
    %48 = arith.mulf %32, %47 : vector<1x512xf32>
    %49 = arith.mulf %37, %48 : vector<1x512xf32>
    %50 = arith.subf %33, %49 : vector<1x512xf32>
    %51 = vector.broadcast %48 : vector<1x512xf32> to vector<16x512xf32>
    %52 = arith.mulf %31, %51 : vector<16x512xf32>
    %53 = vector.broadcast %50 : vector<1x512xf32> to vector<16x512xf32>
    %54 = arith.addf %52, %53 : vector<16x512xf32>
    %cst_19 = arith.constant 0.000000e+00 : f32
    %55 = vector.broadcast %cst_19 : f32 to vector<16x512xf32>
    %56 = arith.maximumf %54, %55 : vector<16x512xf32>
    %57 = arith.truncf %56 : vector<16x512xf32> to vector<16x512xbf16>
    %c0_20 = arith.constant 0 : index
    %c0_21 = arith.constant 0 : index
    %58 = vector.load %arg3[%c0_20, %c0_21] : memref<512x512xbf16, #tpu.memory_space<vmem>>, vector<512x512xbf16>
    %cst_22 = arith.constant dense<0.000000e+00> : vector<16x512xf32>
    %59 = tpu.matmul %57, %58, %cst_22 {dimension_numbers = #tpu.dot_dimension_numbers<[1], [0], [0], [1], [0, 0, 1, 1], [], []>} : vector<16x512xbf16>, vector<512x512xbf16>, vector<16x512xf32> -> vector<16x512xf32>
    %60 = vector.extract_strided_slice %0 {offsets = [2, 0], sizes = [1, 512], strides = [1, 1]} : vector<8x512xf32> to vector<1x512xf32>
    %61 = vector.extract_strided_slice %0 {offsets = [6, 0], sizes = [1, 512], strides = [1, 1]} : vector<8x512xf32> to vector<1x512xf32>
    %cst_23 = arith.constant dense<0.000000e+00> : vector<512xf32>
    %62 = vector.multi_reduction <add>, %59, %cst_23 [0] : vector<16x512xf32> to vector<512xf32>
    %63 = vector.shape_cast %62 : vector<512xf32> to vector<1x512xf32>
    %cst_24 = arith.constant 6.250000e-02 : f32
    %64 = vector.broadcast %cst_24 : f32 to vector<1x512xf32>
    %65 = arith.mulf %63, %64 : vector<1x512xf32>
    %66 = arith.mulf %59, %59 : vector<16x512xf32>
    %cst_25 = arith.constant dense<0.000000e+00> : vector<512xf32>
    %67 = vector.multi_reduction <add>, %66, %cst_25 [0] : vector<16x512xf32> to vector<512xf32>
    %68 = vector.shape_cast %67 : vector<512xf32> to vector<1x512xf32>
    %cst_26 = arith.constant 6.250000e-02 : f32
    %69 = vector.broadcast %cst_26 : f32 to vector<1x512xf32>
    %70 = arith.mulf %68, %69 : vector<1x512xf32>
    %71 = arith.mulf %65, %65 : vector<1x512xf32>
    %72 = arith.subf %70, %71 : vector<1x512xf32>
    %cst_27 = arith.constant 9.99999974E-6 : f32
    %73 = vector.broadcast %cst_27 : f32 to vector<1x512xf32>
    %74 = arith.addf %72, %73 : vector<1x512xf32>
    %75 = math.rsqrt %74 : vector<1x512xf32>
    %76 = arith.mulf %60, %75 : vector<1x512xf32>
    %77 = arith.mulf %65, %76 : vector<1x512xf32>
    %78 = arith.subf %61, %77 : vector<1x512xf32>
    %79 = vector.broadcast %76 : vector<1x512xf32> to vector<16x512xf32>
    %80 = arith.mulf %59, %79 : vector<16x512xf32>
    %81 = vector.broadcast %78 : vector<1x512xf32> to vector<16x512xf32>
    %82 = arith.addf %80, %81 : vector<16x512xf32>
    %cst_28 = arith.constant 0.000000e+00 : f32
    %83 = vector.broadcast %cst_28 : f32 to vector<16x512xf32>
    %84 = arith.maximumf %82, %83 : vector<16x512xf32>
    %85 = arith.truncf %84 : vector<16x512xf32> to vector<16x512xbf16>
    %c0_29 = arith.constant 0 : index
    %c0_30 = arith.constant 0 : index
    %86 = vector.load %arg4[%c0_29, %c0_30] : memref<512x512xbf16, #tpu.memory_space<vmem>>, vector<512x512xbf16>
    %cst_31 = arith.constant dense<0.000000e+00> : vector<16x512xf32>
    %87 = tpu.matmul %85, %86, %cst_31 {dimension_numbers = #tpu.dot_dimension_numbers<[1], [0], [0], [1], [0, 0, 1, 1], [], []>} : vector<16x512xbf16>, vector<512x512xbf16>, vector<16x512xf32> -> vector<16x512xf32>
    %88 = vector.extract_strided_slice %0 {offsets = [3, 0], sizes = [1, 512], strides = [1, 1]} : vector<8x512xf32> to vector<1x512xf32>
    %89 = vector.extract_strided_slice %0 {offsets = [7, 0], sizes = [1, 512], strides = [1, 1]} : vector<8x512xf32> to vector<1x512xf32>
    %cst_32 = arith.constant dense<0.000000e+00> : vector<512xf32>
    %90 = vector.multi_reduction <add>, %87, %cst_32 [0] : vector<16x512xf32> to vector<512xf32>
    %91 = vector.shape_cast %90 : vector<512xf32> to vector<1x512xf32>
    %cst_33 = arith.constant 6.250000e-02 : f32
    %92 = vector.broadcast %cst_33 : f32 to vector<1x512xf32>
    %93 = arith.mulf %91, %92 : vector<1x512xf32>
    %94 = arith.mulf %87, %87 : vector<16x512xf32>
    %cst_34 = arith.constant dense<0.000000e+00> : vector<512xf32>
    %95 = vector.multi_reduction <add>, %94, %cst_34 [0] : vector<16x512xf32> to vector<512xf32>
    %96 = vector.shape_cast %95 : vector<512xf32> to vector<1x512xf32>
    %cst_35 = arith.constant 6.250000e-02 : f32
    %97 = vector.broadcast %cst_35 : f32 to vector<1x512xf32>
    %98 = arith.mulf %96, %97 : vector<1x512xf32>
    %99 = arith.mulf %93, %93 : vector<1x512xf32>
    %100 = arith.subf %98, %99 : vector<1x512xf32>
    %cst_36 = arith.constant 9.99999974E-6 : f32
    %101 = vector.broadcast %cst_36 : f32 to vector<1x512xf32>
    %102 = arith.addf %100, %101 : vector<1x512xf32>
    %103 = math.rsqrt %102 : vector<1x512xf32>
    %104 = arith.mulf %88, %103 : vector<1x512xf32>
    %105 = arith.mulf %93, %104 : vector<1x512xf32>
    %106 = arith.subf %89, %105 : vector<1x512xf32>
    %107 = vector.broadcast %104 : vector<1x512xf32> to vector<16x512xf32>
    %108 = arith.mulf %87, %107 : vector<16x512xf32>
    %109 = vector.broadcast %106 : vector<1x512xf32> to vector<16x512xf32>
    %110 = arith.addf %108, %109 : vector<16x512xf32>
    %cst_37 = arith.constant 0.000000e+00 : f32
    %111 = vector.broadcast %cst_37 : f32 to vector<16x512xf32>
    %112 = arith.maximumf %110, %111 : vector<16x512xf32>
    %113 = arith.truncf %112 : vector<16x512xf32> to vector<16x512xbf16>
    %c0_38 = arith.constant 0 : index
    %c0_39 = arith.constant 0 : index
    %114 = vector.load %arg5[%c0_38, %c0_39] : memref<512x16xbf16, #tpu.memory_space<vmem>>, vector<512x16xbf16>
    %cst_40 = arith.constant dense<0.000000e+00> : vector<16x16xf32>
    %115 = tpu.matmul %113, %114, %cst_40 {dimension_numbers = #tpu.dot_dimension_numbers<[1], [0], [0], [1], [0, 0, 1, 1], [], []>} : vector<16x512xbf16>, vector<512x16xbf16>, vector<16x16xf32> -> vector<16x16xf32>
    %c0_41 = arith.constant 0 : index
    %c0_42 = arith.constant 0 : index
    %116 = vector.load %arg7[%c0_41, %c0_42] : memref<1x16xf32, #tpu.memory_space<vmem>>, vector<1x16xf32>
    %117 = vector.broadcast %116 : vector<1x16xf32> to vector<16x16xf32>
    %118 = arith.addf %115, %117 : vector<16x16xf32>
    %119 = arith.negf %118 : vector<16x16xf32>
    %120 = math.exp %119 : vector<16x16xf32>
    %cst_43 = arith.constant 1.000000e+00 : f32
    %121 = vector.broadcast %cst_43 : f32 to vector<16x16xf32>
    %122 = arith.addf %121, %120 : vector<16x16xf32>
    %123 = arith.divf %121, %122 : vector<16x16xf32>
    %c0_44 = arith.constant 0 : index
    %c0_45 = arith.constant 0 : index
    %124 = vector.load %arg8[%c0_44, %c0_45] : memref<16x16xf32, #tpu.memory_space<vmem>>, vector<16x16xf32>
    tpu.vector_store %arg8[%c0_44, %c0_45], %123 {strides = array<i32>} : memref<16x16xf32, #tpu.memory_space<vmem>>, vector<16x16xf32>,
    return
  }
}

</mosaic_0001>

<bundles_post_ra>
// kernel: face_mi_model_large.1
= control target key start
LH: loop header
LB: loop body
LE: loop exit
PB: predicated region body
PF: predicated region fallthrough
CT: control target
= control target key end

     0   :  { %13 = vsyncpa [#allocation3], 0  ;;  %s6174_s0 = inlined_call_operand.vmem [shape: bf16[16,128], index: 0, kind: input, shape index: {}]   ;;  %s6175_s1 = inlined_call_operand.vmem [shape: bf16[128,512], index: 1, kind: input, shape index: {}]   ;;  %s6176_s2 = inlined_call_operand.hbm [shape: bf16[512,512], index: 2, kind: input, shape index: {}]   ;;  %s6177_s3 = inlined_call_operand.hbm [shape: bf16[512,512], index: 3, kind: input, shape index: {}]   ;;  %s6178_s4 = inlined_call_operand.hbm [shape: bf16[512,512], index: 4, kind: input, shape index: {}]   ;;  %s6179_s5 = inlined_call_operand.vmem [shape: bf16[512,16], index: 5, kind: input, shape index: {}]   ;;  %s6180_s6 = inlined_call_operand.vmem [shape: f32[8,512], index: 6, kind: input, shape index: {}]   ;;  %s6181_s7 = inlined_call_operand.vmem [shape: f32[1,16], index: 7, kind: input, shape index: {}]   ;;  %s6182_s8 = inlined_call_operand.hbm [shape: f32[16,16], index: 8, kind: output, shape index: {}]  }
   0x1   :  { %14 = vsyncpa [#allocation6], 0 }
   0x2   :  { %15 = vsyncpa [#allocation4], 0  ;;  %s5572_s27 = smov [#allocation5]   ;;  %s5573_s29 = smov [#allocation2]  }
   0x3   :  { %s37_s28 = sshll.u32 %s5572_s27, 4  ;;  %s25_s30 = sshll.u32 %s5573_s29, 4  ;;  %s38_s28 = int_to_ptr.vmem [resolvable:$true] %s37_s28  ;;  %s5626_s30 = int_to_ptr.vmem [resolvable:$true] %s25_s30 }
   0x4   :  { %s5478_s11 = scalar_lea.hbm %s6177_s3, 16384 }
   0x5   :  { %p5479_p0 = scmp.ne.s32.totalorder %s6177_s3, %s5478_s11  ;;  %p5482_p1 = scmp.lt.u32.totalorder %s5478_s11, %s6177_s3 }
   0x7   :  { %p5484_p2 = pnand %p5482_p1, %p5479_p0 }
   0x9   :  { %5487 = shalt.err (!%p5484_p2)
}
   0xa   :  { %s5488_s16 = scalar_lea.vmem %s38_s28, 16384  ;;  %p5493_p4 = scmp.lt.s32.totalorder %s38_s28, %s38_s28 }
   0xb   :  { %p5489_p3 = scmp.ne.s32.totalorder %s38_s28, %s5488_s16  ;;  %p5494_p5 = scmp.lt.s32.totalorder %s5488_s16, %s5488_s16 }
   0xd   :  { %p5495_p6 = por %p5494_p5, %p5493_p4 }
   0xf   :  { %p5496_p7 = pnand %p5495_p6, %p5489_p3 }
  0x11   :  { %5499 = shalt.err (!%p5496_p7)
}
  0x12   :  { %s5574_s17 = smov 256   ;;  %s5575_s18 = smov 16  }
  0x13   :  { %43 = dma.hbm_to_vmem [thread:$0]  %s6177_s3, 16384, %s38_s28, [#allocation6], %s5574_s17, %s5574_s17, %s5575_s18  }
  0x14   :  { %s5500_s23 = scalar_lea.hbm %s6176_s2, 16384 }
  0x15   :  { %p5501_p8 = scmp.ne.s32.totalorder %s6176_s2, %s5500_s23  ;;  %p5504_p9 = scmp.lt.u32.totalorder %s5500_s23, %s6176_s2 }
  0x17   :  { %p5506_p10 = pnand %p5504_p9, %p5501_p8 }
  0x19   :  { %5509 = shalt.err (!%p5506_p10)
}
  0x1a   :  { %s5510_s29 = scalar_lea.vmem %s5626_s30, 16384  ;;  %p5515_p12 = scmp.lt.s32.totalorder %s5626_s30, %s5626_s30 }
  0x1b   :  { %p5511_p11 = scmp.ne.s32.totalorder %s5626_s30, %s5510_s29  ;;  %p5516_p13 = scmp.lt.s32.totalorder %s5510_s29, %s5510_s29 }
  0x1d   :  { %p5517_p0 = por %p5516_p13, %p5515_p12 }
  0x1f   :  { %p5518_p1 = pnand %p5517_p0, %p5511_p11 }
  0x21   :  { %5521 = shalt.err (!%p5518_p1)
}
  0x22   :  { %31 = dma.hbm_to_vmem [thread:$0]  %s6176_s2, 16384, %s5626_s30, [#allocation3], %s5574_s17, %s5574_s17, %s5575_s18  }
  0x23   :  { %s5576_s9 = smov [#allocation7]   ;;  %s5522_s13 = scalar_lea.hbm %s6178_s4, 16384 }
  0x24   :  { %s49_s10 = sshll.u32 %s5576_s9, 4  ;;  %p5523_p2 = scmp.ne.s32.totalorder %s6178_s4, %s5522_s13  ;;  %s50_s10 = int_to_ptr.vmem [resolvable:$true] %s49_s10 }
  0x25   :  { %p5526_p3 = scmp.lt.u32.totalorder %s5522_s13, %s6178_s4 }
  0x27   :  { %p5528_p4 = pnand %p5526_p3, %p5523_p2 }
  0x29   :  { %5531 = shalt.err (!%p5528_p4)
}
  0x2a   :  { %s5532_s20 = scalar_lea.vmem %s50_s10, 16384  ;;  %p5537_p6 = scmp.lt.s32.totalorder %s50_s10, %s50_s10 }
  0x2b   :  { %p5533_p5 = scmp.ne.s32.totalorder %s50_s10, %s5532_s20  ;;  %p5538_p7 = scmp.lt.s32.totalorder %s5532_s20, %s5532_s20 }
  0x2d   :  { %p5539_p8 = por %p5538_p7, %p5537_p6 }
  0x2f   :  { %p5540_p9 = pnand %p5539_p8, %p5533_p5 }
  0x31   :  { %5543 = shalt.err (!%p5540_p9)
}
  0x32   :  { %55 = dma.hbm_to_vmem [thread:$0]  %s6178_s4, 16384, %s50_s10, [#allocation6], %s5574_s17, %s5574_s17, %s5575_s18  }
  0x33   :  { %5566 = dma.done.wait [#allocation3], 16384  }
  0x34   :  { %5567 = vsyncadd [#allocation3], 4294950912 }
  0x35   :  { %5568 = dma.done.wait [#allocation6], 32768  }
  0x36   :  { %5569 = vsyncadd [#allocation6], 4294934528  ;;  %v5577_v0 = vmov 0   ;;  %v4777_v1 = vld [vmem:[%s6175_s1 + $0x4] ss:$16 sps:$4 sm:$0xff]   ;;  %vm4227_vm0 = vcmask 130048  }
  0x37   :  { %308 = vmatprep.mubr.bf16.mxu0 %v5577_v0  ;;  %351 = vmatprep.mubr.bf16.mxu1 %v5577_v0  ;;  %v4779_v2 = vld [vmem:[%s6175_s1] ss:$16 sps:$4 sm:$0xff]   ;;  %v4780_v3 = vld [vmem:[%s6175_s1 + $0x24] ss:$16 sps:$4 sm:$0xff]   ;;  %v4792_v7 = vld [vmem:[%s6175_s1 + $0xc] ss:$16 sps:$4 sm:$0xff]  }
  0x38   :  { %276 = vmatprep.subr.bf16.mxu0 %v4777_v1  ;;  %v4782_v4 = vld [vmem:[%s6175_s1 + $0x20] ss:$16 sps:$4 sm:$0xff]   ;;  %v4783_v5 = vld [vmem:[%s6175_s1 + $0x44] ss:$16 sps:$4 sm:$0xff]   ;;  %v4796_v9 = vld [vmem:[%s6175_s1 + $0x8] ss:$16 sps:$4 sm:$0xff]   ;;  %319 = vmatprep.subr.bf16.mxu1 %v4792_v7 }
  0x39   :  { %277 = vmatpush1.bf16.msra.mxu0 %v4779_v2  ;;  %v4785_v6 = vld [vmem:[%s6175_s1 + $0x40] ss:$16 sps:$4 sm:$0xff]   ;;  %v4786_v8 = vld [vmem:[%s6175_s1 + $0x64] ss:$16 sps:$4 sm:$0xff]   ;;  %320 = vmatpush1.bf16.msra.mxu1 %v4796_v9  ;;  %v4798_v10 = vld [vmem:[%s6175_s1 + $0x2c] ss:$16 sps:$4 sm:$0xff]  }
  0x3a   :  { %278 = vmatprep.subr.bf16.mxu0 %v4780_v3  ;;  %v4788_v11 = vld [vmem:[%s6175_s1 + $0x60] ss:$16 sps:$4 sm:$0xff]   ;;  %v4789_v12 = vld [vmem:[%s6175_s1 + $0x84] ss:$16 sps:$4 sm:$0xff]   ;;  %v4802_v13 = vld [vmem:[%s6175_s1 + $0x28] ss:$16 sps:$4 sm:$0xff]   ;;  %321 = vmatprep.subr.bf16.mxu1 %v4798_v10 }
  0x3b   :  { %v4804_v14 = vld [vmem:[%s6175_s1 + $0x4c] ss:$16 sps:$4 sm:$0xff]   ;;  %v4791_v15 = vld [vmem:[%s6175_s1 + $0x80] ss:$16 sps:$4 sm:$0xff]   ;;  %v4808_v16 = vld [vmem:[%s6175_s1 + $0x48] ss:$16 sps:$4 sm:$0xff]  }
  0x3c   :  { %v4810_v17 = vld [vmem:[%s6175_s1 + $0x6c] ss:$16 sps:$4 sm:$0xff]   ;;  %v4794_v18 = vld [vmem:[%s6175_s1 + $0xa4] ss:$16 sps:$4 sm:$0xff]   ;;  %v4813_v19 = vld [vmem:[%s6175_s1 + $0x68] ss:$16 sps:$4 sm:$0xff]  }
  0x3d   :  { %279 = vmatpush1.bf16.msra.mxu0 %v4782_v4  ;;  %322 = vmatpush1.bf16.msra.mxu1 %v4802_v13  ;;  %v4797_v20 = vld [vmem:[%s6175_s1 + $0xa0] ss:$16 sps:$4 sm:$0xff]   ;;  %v4814_v21 = vld [vmem:[%s6175_s1 + $0x8c] ss:$16 sps:$4 sm:$0xff]   ;;  %v4800_v22 = vld [vmem:[%s6175_s1 + $0xc4] ss:$16 sps:$4 sm:$0xff]  }
  0x3e   :  { %280 = vmatprep.subr.bf16.mxu0 %v4783_v5  ;;  %323 = vmatprep.subr.bf16.mxu1 %v4804_v14  ;;  %v4816_v23 = vld [vmem:[%s6175_s1 + $0x88] ss:$16 sps:$4 sm:$0xff]   ;;  %v4803_v24 = vld [vmem:[%s6175_s1 + $0xc0] ss:$16 sps:$4 sm:$0xff]   ;;  %v4817_v25 = vld [vmem:[%s6175_s1 + $0xac] ss:$16 sps:$4 sm:$0xff]  }
  0x3f   :  { %v4806_v26 = vld [vmem:[%s6175_s1 + $0xe4] ss:$16 sps:$4 sm:$0xff]   ;;  %v4819_v27 = vld [vmem:[%s6175_s1 + $0xa8] ss:$16 sps:$4 sm:$0xff]   ;;  %v4809_v28 = vld [vmem:[%s6175_s1 + $0xe0] ss:$16 sps:$4 sm:$0xff]  }
  0x40   :  { %v4820_v29 = vld [vmem:[%s6175_s1 + $0xcc] ss:$16 sps:$4 sm:$0xff]   ;;  %v4812_v30 = vld [vmem:[%s6174_s0] sm:$0xff]   ;;  %v4822_v31 = vld [vmem:[%s6175_s1 + $0xc8] ss:$16 sps:$4 sm:$0xff]  }
  0x41   :  { %281 = vmatpush1.bf16.msra.mxu0 %v4785_v6  ;;  %324 = vmatpush1.bf16.msra.mxu1 %v4808_v16  ;;  %v4828_v32 = vld [vmem:[#allocation2 + $0x4] ss:$16 sps:$4 sm:$0xff]   ;;  %v4823_v33 = vld [vmem:[%s6175_s1 + $0xec] ss:$16 sps:$4 sm:$0xff]   ;;  %v4826_v34 = vld [vmem:[#allocation2] ss:$16 sps:$4 sm:$0xff]  }
  0x42   :  { %282 = vmatprep.subr.bf16.mxu0 %v4786_v8  ;;  %325 = vmatprep.subr.bf16.mxu1 %v4810_v17  ;;  %v4834_v35 = vld [vmem:[#allocation2 + $0x24] ss:$16 sps:$4 sm:$0xff]   ;;  %v4825_v36 = vld [vmem:[%s6175_s1 + $0xe8] ss:$16 sps:$4 sm:$0xff]   ;;  %v4831_v37 = vld [vmem:[#allocation2 + $0xc] ss:$16 sps:$4 sm:$0xff]  }
  0x43   :  { %v4832_v38 = vld [vmem:[#allocation2 + $0x20] ss:$16 sps:$4 sm:$0xff]   ;;  %v4840_v39 = vld [vmem:[#allocation2 + $0x44] ss:$16 sps:$4 sm:$0xff]   ;;  %v4829_v40 = vld [vmem:[#allocation2 + $0x8] ss:$16 sps:$4 sm:$0xff]  }
  0x44   :  { %v4837_v41 = vld [vmem:[#allocation2 + $0x2c] ss:$16 sps:$4 sm:$0xff]   ;;  %v4838_v42 = vld [vmem:[#allocation2 + $0x40] ss:$16 sps:$4 sm:$0xff]   ;;  %v4835_v43 = vld [vmem:[#allocation2 + $0x28] ss:$16 sps:$4 sm:$0xff]  }
  0x45   :  { %283 = vmatpush1.bf16.msra.mxu0 %v4788_v11  ;;  %326 = vmatpush1.bf16.msra.mxu1 %v4813_v19  ;;  %v4843_v44 = vld [vmem:[#allocation2 + $0x4c] ss:$16 sps:$4 sm:$0xff]   ;;  %v4841_v45 = vld [vmem:[#allocation2 + $0x48] ss:$16 sps:$4 sm:$0xff]   ;;  %v4846_v46 = vld [vmem:[#allocation2 + $0x64] ss:$16 sps:$4 sm:$0xff]  }
  0x46   :  { %284 = vmatprep.subr.bf16.mxu0 %v4789_v12  ;;  %327 = vmatprep.subr.bf16.mxu1 %v4814_v21  ;;  %v4849_v47 = vld [vmem:[#allocation2 + $0x6c] ss:$16 sps:$4 sm:$0xff]   ;;  %v4844_v48 = vld [vmem:[#allocation2 + $0x60] ss:$16 sps:$4 sm:$0xff]   ;;  %v4847_v49 = vld [vmem:[#allocation2 + $0x68] ss:$16 sps:$4 sm:$0xff]  }
  0x47   :  { %v4852_v50 = vld [vmem:[#allocation2 + $0x84] ss:$16 sps:$4 sm:$0xff]   ;;  %v4855_v51 = vld [vmem:[#allocation2 + $0x8c] ss:$16 sps:$4 sm:$0xff]   ;;  %v4850_v52 = vld [vmem:[#allocation2 + $0x80] ss:$16 sps:$4 sm:$0xff]  }
  0x48   :  { %v4853_v53 = vld [vmem:[#allocation2 + $0x88] ss:$16 sps:$4 sm:$0xff]   ;;  %v4858_v54 = vld [vmem:[#allocation2 + $0xa4] ss:$16 sps:$4 sm:$0xff]   ;;  %v4861_v55 = vld [vmem:[#allocation2 + $0xac] ss:$16 sps:$4 sm:$0xff]  }
  0x49   :  { %285 = vmatpush1.bf16.msra.mxu0 %v4791_v15  ;;  %328 = vmatpush1.bf16.msra.mxu1 %v4816_v23  ;;  %v4856_v56 = vld [vmem:[#allocation2 + $0xa0] ss:$16 sps:$4 sm:$0xff]   ;;  %v4859_v57 = vld [vmem:[#allocation2 + $0xa8] ss:$16 sps:$4 sm:$0xff]   ;;  %v4864_v58 = vld [vmem:[#allocation2 + $0xc4] ss:$16 sps:$4 sm:$0xff]  }
  0x4a   :  { %286 = vmatprep.subr.bf16.mxu0 %v4794_v18  ;;  %329 = vmatprep.subr.bf16.mxu1 %v4817_v25  ;;  %v4867_v59 = vld [vmem:[#allocation2 + $0xcc] ss:$16 sps:$4 sm:$0xff]   ;;  %v4862_v60 = vld [vmem:[#allocation2 + $0xc0] ss:$16 sps:$4 sm:$0xff]   ;;  %v4865_v61 = vld [vmem:[#allocation2 + $0xc8] ss:$16 sps:$4 sm:$0xff]  }
  0x4b   :  { %v4870_v62 = vld [vmem:[#allocation2 + $0xe4] ss:$16 sps:$4 sm:$0xff]   ;;  %v4873_v63 = vld [vmem:[#allocation2 + $0xec] ss:$16 sps:$4 sm:$0xff]   ;;  %v4868_v0 = vld [vmem:[#allocation2 + $0xe0] ss:$16 sps:$4 sm:$0xff]  }
  0x4c   :  { %v4871_v1 = vld [vmem:[#allocation2 + $0xe8] ss:$16 sps:$4 sm:$0xff]   ;;  %v4876_v2 = vld [vmem:[#allocation2 + $0x104] ss:$16 sps:$4 sm:$0xff]   ;;  %v4879_v3 = vld [vmem:[#allocation2 + $0x10c] ss:$16 sps:$4 sm:$0xff]  }
  0x4d   :  { %287 = vmatpush1.bf16.msra.mxu0 %v4797_v20  ;;  %330 = vmatpush1.bf16.msra.mxu1 %v4819_v27  ;;  %v4874_v4 = vld [vmem:[#allocation2 + $0x100] ss:$16 sps:$4 sm:$0xff]   ;;  %v4877_v5 = vld [vmem:[#allocation2 + $0x108] ss:$16 sps:$4 sm:$0xff]   ;;  %v4882_v6 = vld [vmem:[#allocation2 + $0x124] ss:$16 sps:$4 sm:$0xff]  }
  0x4e   :  { %288 = vmatprep.subr.bf16.mxu0 %v4800_v22  ;;  %331 = vmatprep.subr.bf16.mxu1 %v4820_v29  ;;  %v4885_v7 = vld [vmem:[#allocation2 + $0x12c] ss:$16 sps:$4 sm:$0xff]   ;;  %v4880_v8 = vld [vmem:[#allocation2 + $0x120] ss:$16 sps:$4 sm:$0xff]   ;;  %v4883_v9 = vld [vmem:[#allocation2 + $0x128] ss:$16 sps:$4 sm:$0xff]  }
  0x4f   :  { %v4888_v10 = vld [vmem:[#allocation2 + $0x144] ss:$16 sps:$4 sm:$0xff]   ;;  %v4891_v11 = vld [vmem:[#allocation2 + $0x14c] ss:$16 sps:$4 sm:$0xff]   ;;  %v4886_v12 = vld [vmem:[#allocation2 + $0x140] ss:$16 sps:$4 sm:$0xff]  }
  0x50   :  { %v4889_v13 = vld [vmem:[#allocation2 + $0x148] ss:$16 sps:$4 sm:$0xff]   ;;  %v4894_v14 = vld [vmem:[#allocation2 + $0x164] ss:$16 sps:$4 sm:$0xff]   ;;  %v4897_v15 = vld [vmem:[#allocation2 + $0x16c] ss:$16 sps:$4 sm:$0xff]  }
  0x51   :  { %289 = vmatpush1.bf16.msra.mxu0 %v4803_v24  ;;  %332 = vmatpush1.bf16.msra.mxu1 %v4822_v31  ;;  %v4892_v16 = vld [vmem:[#allocation2 + $0x160] ss:$16 sps:$4 sm:$0xff]   ;;  %v4895_v17 = vld [vmem:[#allocation2 + $0x168] ss:$16 sps:$4 sm:$0xff]   ;;  %v4900_v18 = vld [vmem:[#allocation2 + $0x184] ss:$16 sps:$4 sm:$0xff]  }
  0x52   :  { %290 = vmatprep.subr.bf16.mxu0 %v4806_v26  ;;  %333 = vmatprep.subr.bf16.mxu1 %v4823_v33  ;;  %v4903_v19 = vld [vmem:[#allocation2 + $0x18c] ss:$16 sps:$4 sm:$0xff]   ;;  %v4898_v20 = vld [vmem:[#allocation2 + $0x180] ss:$16 sps:$4 sm:$0xff]   ;;  %v4901_v21 = vld [vmem:[#allocation2 + $0x188] ss:$16 sps:$4 sm:$0xff]  }
  0x53   :  { %v4906_v22 = vld [vmem:[#allocation2 + $0x1a4] ss:$16 sps:$4 sm:$0xff]   ;;  %v4909_v23 = vld [vmem:[#allocation2 + $0x1ac] ss:$16 sps:$4 sm:$0xff]   ;;  %v4904_v24 = vld [vmem:[#allocation2 + $0x1a0] ss:$16 sps:$4 sm:$0xff]  }
  0x54   :  { %v4907_v25 = vld [vmem:[#allocation2 + $0x1a8] ss:$16 sps:$4 sm:$0xff]   ;;  %v4912_v26 = vld [vmem:[#allocation2 + $0x1c4] ss:$16 sps:$4 sm:$0xff]   ;;  %v4915_v27 = vld [vmem:[#allocation2 + $0x1cc] ss:$16 sps:$4 sm:$0xff]  }
  0x55   :  { %291 = vmatpush1.bf16.msra.mxu0 %v4809_v28  ;;  %334 = vmatpush1.bf16.msra.mxu1 %v4825_v36  ;;  %v4910_v28 = vld [vmem:[#allocation2 + $0x1c0] ss:$16 sps:$4 sm:$0xff]   ;;  %v4913_v29 = vld [vmem:[#allocation2 + $0x1c8] ss:$16 sps:$4 sm:$0xff]   ;;  %v4921_v31 = vld [vmem:[#allocation2 + $0x1ec] ss:$16 sps:$4 sm:$0xff]  }
  0x56   :  { %1302 = vmatprep.subr.bf16.mxu0 %v4828_v32  ;;  %1388 = vmatprep.subr.bf16.mxu1 %v4831_v37  ;;  %v4916_v32 = vld [vmem:[#allocation2 + $0x1e0] ss:$16 sps:$4 sm:$0xff]   ;;  %v4919_v33 = vld [vmem:[#allocation2 + $0x1e8] ss:$16 sps:$4 sm:$0xff]  }
  0x58   :  { %309 = vmatmul.mubr.bf16.vlgmr.msra.gmra.mrb[0].mxu0 %v4812_v30  ;;  %352 = vmatmul.mubr.bf16.vlgmr.msra.gmra.mrb[0].mxu1 %v4812_v30  ;;  %v4918_v30 = vld [vmem:[#allocation2 + $0x1e4] ss:$16 sps:$4 sm:$0xff]  }
  0x59   :  { %1303 = vmatpush1.bf16.msra.mxu0 %v4826_v34  ;;  %1389 = vmatpush1.bf16.msra.mxu1 %v4829_v40  ;;  %v4924_v34 = vld [vmem:[#allocation2 + $0x204] ss:$16 sps:$4 sm:$0xff]  }
  0x5a   :  { %1304 = vmatprep.subr.bf16.mxu0 %v4834_v35  ;;  %1390 = vmatprep.subr.bf16.mxu1 %v4837_v41  ;;  %v4927_v35 = vld [vmem:[#allocation2 + $0x20c] ss:$16 sps:$4 sm:$0xff]  }
  0x5d   :  { %1305 = vmatpush1.bf16.msra.mxu0 %v4832_v38  ;;  %1391 = vmatpush1.bf16.msra.mxu1 %v4835_v43 }
  0x5e   :  { %1306 = vmatprep.subr.bf16.mxu0 %v4840_v39  ;;  %1392 = vmatprep.subr.bf16.mxu1 %v4843_v44 }
  0x61   :  { %1307 = vmatpush1.bf16.msra.mxu0 %v4838_v42  ;;  %1393 = vmatpush1.bf16.msra.mxu1 %v4841_v45 }
  0x62   :  { %1308 = vmatprep.subr.bf16.mxu0 %v4846_v46  ;;  %1394 = vmatprep.subr.bf16.mxu1 %v4849_v47 }
  0x65   :  { %1309 = vmatpush1.bf16.msra.mxu0 %v4844_v48  ;;  %1395 = vmatpush1.bf16.msra.mxu1 %v4847_v49 }
  0x66   :  { %1310 = vmatprep.subr.bf16.mxu0 %v4852_v50  ;;  %1396 = vmatprep.subr.bf16.mxu1 %v4855_v51 }
  0x69   :  { %1311 = vmatpush1.bf16.msra.mxu0 %v4850_v52  ;;  %1397 = vmatpush1.bf16.msra.mxu1 %v4853_v53 }
  0x6a   :  { %1312 = vmatprep.subr.bf16.mxu0 %v4858_v54  ;;  %1398 = vmatprep.subr.bf16.mxu1 %v4861_v55 }
  0x6d   :  { %1313 = vmatpush1.bf16.msra.mxu0 %v4856_v56  ;;  %1399 = vmatpush1.bf16.msra.mxu1 %v4859_v57 }
  0x6e   :  { %1314 = vmatprep.subr.bf16.mxu0 %v4864_v58  ;;  %1400 = vmatprep.subr.bf16.mxu1 %v4867_v59 }
  0x71   :  { %1315 = vmatpush1.bf16.msra.mxu0 %v4862_v60  ;;  %1401 = vmatpush1.bf16.msra.mxu1 %v4865_v61 }
  0x72   :  { %1316 = vmatprep.subr.bf16.mxu0 %v4870_v62  ;;  %1402 = vmatprep.subr.bf16.mxu1 %v4873_v63 }
  0x75   :  { %1317 = vmatpush1.bf16.msra.mxu0 %v4868_v0  ;;  %1403 = vmatpush1.bf16.msra.mxu1 %v4871_v1 }
  0x76   :  { %1318 = vmatprep.subr.bf16.mxu0 %v4876_v2  ;;  %1404 = vmatprep.subr.bf16.mxu1 %v4879_v3 }
  0x79   :  { %1319 = vmatpush1.bf16.msra.mxu0 %v4874_v4  ;;  %1405 = vmatpush1.bf16.msra.mxu1 %v4877_v5 }
  0x7a   :  { %1320 = vmatprep.subr.bf16.mxu0 %v4882_v6  ;;  %1406 = vmatprep.subr.bf16.mxu1 %v4885_v7 }
  0x7d   :  { %1321 = vmatpush1.bf16.msra.mxu0 %v4880_v8  ;;  %1407 = vmatpush1.bf16.msra.mxu1 %v4883_v9 }
  0x7e   :  { %1322 = vmatprep.subr.bf16.mxu0 %v4888_v10  ;;  %1408 = vmatprep.subr.bf16.mxu1 %v4891_v11 }
  0x81   :  { %1323 = vmatpush1.bf16.msra.mxu0 %v4886_v12  ;;  %1409 = vmatpush1.bf16.msra.mxu1 %v4889_v13 }
  0x82   :  { %1324 = vmatprep.subr.bf16.mxu0 %v4894_v14  ;;  %1410 = vmatprep.subr.bf16.mxu1 %v4897_v15 }
  0x85   :  { %1325 = vmatpush1.bf16.msra.mxu0 %v4892_v16  ;;  %1411 = vmatpush1.bf16.msra.mxu1 %v4895_v17 }
  0x86   :  { %1326 = vmatprep.subr.bf16.mxu0 %v4900_v18  ;;  %1412 = vmatprep.subr.bf16.mxu1 %v4903_v19 }
  0x89   :  { %1327 = vmatpush1.bf16.msra.mxu0 %v4898_v20  ;;  %1413 = vmatpush1.bf16.msra.mxu1 %v4901_v21 }
  0x8a   :  { %1328 = vmatprep.subr.bf16.mxu0 %v4906_v22  ;;  %1414 = vmatprep.subr.bf16.mxu1 %v4909_v23 }
  0x8d   :  { %1329 = vmatpush1.bf16.msra.mxu0 %v4904_v24  ;;  %1415 = vmatpush1.bf16.msra.mxu1 %v4907_v25 }
  0x8e   :  { %1330 = vmatprep.subr.bf16.mxu0 %v4912_v26  ;;  %1416 = vmatprep.subr.bf16.mxu1 %v4915_v27 }
  0x91   :  { %1331 = vmatpush1.bf16.msra.mxu0 %v4910_v28  ;;  %1417 = vmatpush1.bf16.msra.mxu1 %v4913_v29 }
  0x92   :  { %1332 = vmatprep.subr.bf16.mxu0 %v4918_v30  ;;  %1418 = vmatprep.subr.bf16.mxu1 %v4921_v31 }
  0x95   :  { %1333 = vmatpush1.bf16.msra.mxu0 %v4916_v32  ;;  %1419 = vmatpush1.bf16.msra.mxu1 %v4919_v33 }
  0x96   :  { %1345 = vmatprep.subr.bf16.mxu0 %v4924_v34  ;;  %1431 = vmatprep.subr.bf16.mxu1 %v4927_v35 }
 0x12b   :  { %v5777_v36 = vpop.f32.mrb[0].mxu0  ;;  %v5797_v52 = vpop.f32.mrb[0].mxu1 }
 0x12c   :  { %v5779_v37 = vpop.f32.mrb[1].mxu0  ;;  %v394_v39 = vmul.f32 %v5777_v36, %v5777_v36  ;;  %v396_v55 = vmul.f32 %v5797_v52, %v5797_v52  ;;  %v5801_v56 = vpop.f32.mrb[1].mxu1 }
 0x12d   :  { %v5781_v38 = vpop.f32.mrb[2].mxu0  ;;  %v395_v43 = vmul.f32 %v5779_v37, %v5779_v37  ;;  %v397_v59 = vmul.f32 %v5801_v56, %v5801_v56  ;;  %v5805_v60 = vpop.f32.mrb[2].mxu1 }
 0x12e   :  { %v362_v40 = vadd.f32 %v5781_v38, %v5777_v36  ;;  %v398_v41 = vmul.f32 %v5781_v38, %v5781_v38  ;;  %v5789_v42 = vpop.f32.mrb[3].mxu0  ;;  %v376_v63 = vadd.f32 %v5805_v60, %v5797_v52  ;;  %v400_v0 = vmul.f32 %v5805_v60, %v5805_v60  ;;  %v5811_v1 = vpop.f32.mrb[3].mxu1 }
 0x12f   :  { %v369_v44 = vadd.f32 %v5789_v42, %v5779_v37  ;;  %v399_v45 = vmul.f32 %v5789_v42, %v5789_v42  ;;  %v383_v4 = vadd.f32 %v5811_v1, %v5801_v56  ;;  %v401_v5 = vmul.f32 %v5811_v1, %v5811_v1 }
 0x130   :  { %v363_v46 = vrot.slane %v362_v40, 4  ;;  %v402_v47 = vadd.f32 %v398_v41, %v394_v39  ;;  %v377_v8 = vrot.slane %v376_v63, 4  ;;  %v416_v9 = vadd.f32 %v400_v0, %v396_v55 }
 0x131   :  { %v370_v48 = vrot.slane %v369_v44, 4  ;;  %v409_v49 = vadd.f32 %v399_v45, %v395_v43  ;;  %v384_v12 = vrot.slane %v383_v4, 4  ;;  %v423_v13 = vadd.f32 %v401_v5, %v397_v59 }
 0x132   :  { %v364_v50 = vadd.f32 %v363_v46, %v362_v40  ;;  %v403_v51 = vrot.slane %v402_v47, 4  ;;  %v378_v16 = vadd.f32 %v377_v8, %v376_v63  ;;  %v417_v17 = vrot.slane %v416_v9, 4 }
 0x133   :  { %v371_v53 = vadd.f32 %v370_v48, %v369_v44  ;;  %v410_v54 = vrot.slane %v409_v49, 4  ;;  %v385_v20 = vadd.f32 %v384_v12, %v383_v4  ;;  %v424_v21 = vrot.slane %v423_v13, 4  ;;  %v5828_v12 = vld [vmem:[%s6180_s6 + $0x8] sm:$0xff] }
 0x134   :  { %v365_v57 = vrot.slane %v364_v50, 2  ;;  %v404_v58 = vadd.f32 %v403_v51, %v402_v47  ;;  %v379_v24 = vrot.slane %v378_v16, 2  ;;  %v418_v25 = vadd.f32 %v417_v17, %v416_v9 }
 0x135   :  { %v372_v61 = vrot.slane %v371_v53, 2  ;;  %v411_v62 = vadd.f32 %v410_v54, %v409_v49  ;;  %v386_v28 = vrot.slane %v385_v20, 2  ;;  %v425_v29 = vadd.f32 %v424_v21, %v423_v13 }
 0x136   :  { %v366_v2 = vadd.f32 %v365_v57, %v364_v50  ;;  %v405_v3 = vrot.slane %v404_v58, 2  ;;  %v380_v32 = vadd.f32 %v379_v24, %v378_v16  ;;  %v419_v33 = vrot.slane %v418_v25, 2 }
 0x137   :  { %v373_v6 = vadd.f32 %v372_v61, %v371_v53  ;;  %v412_v7 = vrot.slane %v411_v62, 2  ;;  %v387_v39 = vadd.f32 %v386_v28, %v385_v20  ;;  %v426_v40 = vrot.slane %v425_v29, 2 }
 0x138   :  { %v367_v10 = vrot.slane %v366_v2, 1  ;;  %v406_v11 = vadd.f32 %v405_v3, %v404_v58  ;;  %v381_v44 = vrot.slane %v380_v32, 1  ;;  %v420_v45 = vadd.f32 %v419_v33, %v418_v25  ;;  %v5838_v25 = vld [vmem:[%s6180_s6 + $0x10] sm:$0xff] }
 0x139   :  { %v374_v14 = vrot.slane %v373_v6, 1  ;;  %v413_v15 = vadd.f32 %v412_v7, %v411_v62  ;;  %v388_v47 = vrot.slane %v387_v39, 1  ;;  %v427_v48 = vadd.f32 %v426_v40, %v425_v29  ;;  %v5845_v29 = vld [vmem:[%s6180_s6 + $0x18] sm:$0xff] }
 0x13a   :  { %v368_v18 = vadd.f32 %v367_v10, %v366_v2  ;;  %v407_v19 = vrot.slane %v406_v11, 1  ;;  %v382_v50 = vadd.f32 %v381_v44, %v380_v32  ;;  %v421_v51 = vrot.slane %v420_v45, 1  ;;  %v5822_v10 = vld [vmem:[%s6180_s6] sm:$0xff] }
 0x13b   :  { %v375_v22 = vadd.f32 %v374_v14, %v373_v6  ;;  %v414_v23 = vrot.slane %v413_v15, 1  ;;  %v389_v54 = vadd.f32 %v388_v47, %v387_v39  ;;  %v428_v55 = vrot.slane %v427_v48, 1 }
 0x13c   :  { %v390_v26 = vmul.f32 0.0625, %v368_v18  ;;  %v408_v27 = vadd.f32 %v407_v19, %v406_v11  ;;  %v392_v58 = vmul.f32 0.0625, %v382_v50  ;;  %v422_v59 = vadd.f32 %v421_v51, %v420_v45 }
 0x13d   :  { %v391_v30 = vmul.f32 0.0625, %v375_v22  ;;  %v415_v31 = vadd.f32 %v414_v23, %v413_v15  ;;  %v393_v61 = vmul.f32 0.0625, %v389_v54  ;;  %v429_v62 = vadd.f32 %v428_v55, %v427_v48 }
 0x13e   :  { %v430_v34 = vmul.f32 0.0625, %v408_v27  ;;  %v434_v35 = vmul.f32 %v390_v26, %v390_v26  ;;  %v474_v63 = vlaneseq  ;;  %v432_v0 = vmul.f32 0.0625, %v422_v59 }
 0x13f   :  { %v431_v41 = vmul.f32 0.0625, %v415_v31  ;;  %v435_v43 = vmul.f32 %v391_v30, %v391_v30  ;;  %v436_v2 = vmul.f32 %v392_v58, %v392_v58  ;;  %v433_v3 = vmul.f32 0.0625, %v429_v62 }
 0x140   :  { %v438_v46 = vsub.f32 %v430_v34, %v434_v35  ;;  %v437_v4 = vmul.f32 %v393_v61, %v393_v61  ;;  %v5817_v7 = vshrl.u32 %v474_v63, 7 }
 0x141   :  { %v439_v49 = vsub.f32 %v431_v41, %v435_v43  ;;  %v440_v5 = vsub.f32 %v432_v0, %v436_v2  ;;  %v4922_v2 = vld [vmem:[#allocation2 + $0x200] ss:$16 sps:$4 sm:$0xff]  }
 0x142   :  { %v442_v53 = vadd.f32 1e-05, %v438_v46  ;;  %v441_v6 = vsub.f32 %v433_v3, %v437_v4  ;;  %v476_v11 = vsub.s32 0, %v5817_v7  ;;  %v500_v24 = vsub.s32 4, %v5817_v7  ;;  %v4925_v3 = vld [vmem:[#allocation2 + $0x208] ss:$16 sps:$4 sm:$0xff]  }
 0x143   :  { %v443_v57 = vadd.f32 1e-05, %v439_v49  ;;  %v444_v8 = vadd.f32 1e-05, %v440_v5  ;;  %v4933_v5 = vld [vmem:[#allocation2 + $0x22c] ss:$16 sps:$4 sm:$0xff]  }
 0x144   :  { %5434 = vrsqrt.f32 %v442_v53  ;;  %v445_v9 = vadd.f32 1e-05, %v441_v6 }
 0x145   :  { %5436 = vrsqrt.f32 %v443_v57 }
 0x146   :  { %5438 = vrsqrt.f32 %v444_v8 }
 0x147   :  { %5440 = vrsqrt.f32 %v445_v9 }
 0x14e   :  { %v5435_v13 = vpop.eup %5434 }
 0x14f   :  { %v5437_v14 = vpop.eup %5436  ;;  %v450_v15 = vmul.f32 %v5435_v13, %v5822_v10  ;;  %v4928_v13 = vld [vmem:[#allocation2 + $0x220] ss:$16 sps:$4 sm:$0xff]  }
 0x150   :  { %v451_v16 = vmul.f32 %v5437_v14, %v5828_v12  ;;  %v4931_v14 = vld [vmem:[#allocation2 + $0x228] ss:$16 sps:$4 sm:$0xff]  }
 0x151   :  { %v454_v17 = vmul.f32 %v450_v15, %v390_v26  ;;  %v477_v18 = vrot.slane %v450_v15, %v476_v11 }
 0x152   :  { %v455_v19 = vmul.f32 %v451_v16, %v391_v30  ;;  %v481_v20 = vrot.slane %v451_v16, %v476_v11  ;;  %v4936_v16 = vld [vmem:[#allocation2 + $0x244] ss:$16 sps:$4 sm:$0xff]  }
 0x153   :  { %v462_v21 = vrot.slane %v454_v17, 4  ;;  %v490_v22 = vmul.f32 %v477_v18, %v5777_v36  ;;  %v494_v23 = vmul.f32 %v477_v18, %v5781_v38  ;;  %v5439_v36 = vpop.eup %5438  ;;  %v4939_v17 = vld [vmem:[#allocation2 + $0x24c] ss:$16 sps:$4 sm:$0xff]  }
 0x154   :  { %v463_v27 = vrot.slane %v455_v19, 4  ;;  %v491_v28 = vmul.f32 %v481_v20, %v5779_v37  ;;  %v495_v26 = vmul.f32 %v481_v20, %v5789_v42  ;;  %v5441_v30 = vpop.eup %5440  ;;  %v452_v32 = vmul.f32 %v5439_v36, %v5838_v25  ;;  %v4934_v19 = vld [vmem:[#allocation2 + $0x240] ss:$16 sps:$4 sm:$0xff]   ;;  %v4937_v20 = vld [vmem:[#allocation2 + $0x248] ss:$16 sps:$4 sm:$0xff]  }
 0x155   :  { %v470_v38 = vsub.f32 %v5822_v10, %v462_v21  ;;  %v453_v34 = vmul.f32 %v5441_v30, %v5845_v29  ;;  %v4942_v21 = vld [vmem:[#allocation2 + $0x264] ss:$16 sps:$4 sm:$0xff]   ;;  %v4949_v36 = vld [vmem:[#allocation2 + $0x288] ss:$16 sps:$4 sm:$0xff]   ;;  %v4957_v30 = vld [vmem:[#allocation2 + $0x2ac] ss:$16 sps:$4 sm:$0xff]  }
 0x156   :  { %v471_v31 = vsub.f32 %v5828_v12, %v463_v27  ;;  %v456_v37 = vmul.f32 %v452_v32, %v392_v58  ;;  %v485_v39 = vrot.slane %v452_v32, %v476_v11  ;;  %v4948_v27 = vld [vmem:[#allocation2 + $0x284] ss:$16 sps:$4 sm:$0xff]   ;;  %v4955_v32 = vld [vmem:[#allocation2 + $0x2a8] ss:$16 sps:$4 sm:$0xff]  }
 0x157   :  { %v501_v33 = vrot.slane %v470_v38, %v500_v24  ;;  %v457_v41 = vmul.f32 %v453_v34, %v393_v61  ;;  %v489_v43 = vrot.slane %v453_v34, %v476_v11  ;;  %v4954_v38 = vld [vmem:[#allocation2 + $0x2a4] ss:$16 sps:$4 sm:$0xff]   ;;  %v4963_v34 = vld [vmem:[#allocation2 + $0x2cc] ss:$16 sps:$4 sm:$0xff]  }
 0x158   :  { %v505_v35 = vrot.slane %v471_v31, %v500_v24  ;;  %v464_v45 = vrot.slane %v456_v37, 4  ;;  %v492_v46 = vmul.f32 %v485_v39, %v5797_v52  ;;  %v496_v47 = vmul.f32 %v485_v39, %v5805_v60  ;;  %v4952_v31 = vld [vmem:[#allocation2 + $0x2a0] ss:$16 sps:$4 sm:$0xff]   ;;  %v4961_v37 = vld [vmem:[#allocation2 + $0x2c8] ss:$16 sps:$4 sm:$0xff]  }
 0x159   :  { %v514_v42 = vadd.f32 %v501_v33, %v490_v22  ;;  %v518_v40 = vadd.f32 %v501_v33, %v494_v23  ;;  %v465_v49 = vrot.slane %v457_v41, 4  ;;  %v493_v50 = vmul.f32 %v489_v43, %v5801_v56  ;;  %v4930_v56 = vld [vmem:[#allocation2 + $0x224] ss:$16 sps:$4 sm:$0xff]   ;;  %v4945_v22 = vld [vmem:[#allocation2 + $0x26c] ss:$16 sps:$4 sm:$0xff]  }
 0x15a   :  { %v519_v44 = vadd.f32 %v505_v35, %v495_v26  ;;  %v497_v51 = vmul.f32 %v489_v43, %v5811_v1  ;;  %v472_v53 = vsub.f32 %v5838_v25, %v464_v45  ;;  %v515_v54 = vadd.f32 %v505_v35, %v491_v28  ;;  %v4940_v23 = vld [vmem:[#allocation2 + $0x260] ss:$16 sps:$4 sm:$0xff]   ;;  %v4951_v28 = vld [vmem:[#allocation2 + $0x28c] ss:$16 sps:$4 sm:$0xff]   ;;  %v4960_v33 = vld [vmem:[#allocation2 + $0x2c4] ss:$16 sps:$4 sm:$0xff]  }
 0x15b   :  { %v526_v48 = vmax.f32 %v518_v40, 0.0  ;;  %v522_v57 = vmax.f32 %v514_v42, 0.0  ;;  %v473_v58 = vsub.f32 %v5845_v29, %v465_v49  ;;  %v4946_v26 = vld [vmem:[#allocation2 + $0x280] ss:$16 sps:$4 sm:$0xff]   ;;  %v4966_v39 = vld [vmem:[#allocation2 + $0x2e4] ss:$16 sps:$4 sm:$0xff]  }
 0x15c   :  { %v527_v55 = vmax.f32 %v519_v44, 0.0  ;;  %v509_v59 = vrot.slane %v472_v53, %v500_v24  ;;  %v523_v61 = vmax.f32 %v515_v54, 0.0  ;;  %v4958_v35 = vld [vmem:[#allocation2 + $0x2c0] ss:$16 sps:$4 sm:$0xff]   ;;  %v4969_v42 = vld [vmem:[#allocation2 + $0x2ec] ss:$16 sps:$4 sm:$0xff]  }
 0x15d   :  { %v530_v62 = vpack.c.bf16 %v526_v48, %v522_v57  ;;  %v513_v63 = vrot.slane %v473_v58, %v500_v24  ;;  %v4943_v24 = vld [vmem:[#allocation2 + $0x268] ss:$16 sps:$4 sm:$0xff]   ;;  %v4964_v40 = vld [vmem:[#allocation2 + $0x2e0] ss:$16 sps:$4 sm:$0xff]   ;;  %v4972_v43 = vld [vmem:[#allocation2 + $0x304] ss:$16 sps:$4 sm:$0xff]  }
 0x15e   :  { %v516_v52 = vadd.f32 %v509_v59, %v492_v46  ;;  %v520_v0 = vadd.f32 %v509_v59, %v496_v47  ;;  %v531_v60 = vpack.c.bf16 %v527_v55, %v523_v61  ;;  %v4967_v41 = vld [vmem:[#allocation2 + $0x2e8] ss:$16 sps:$4 sm:$0xff]   ;;  %v4975_v44 = vld [vmem:[#allocation2 + $0x30c] ss:$16 sps:$4 sm:$0xff]   ;;  %v4970_v45 = vld [vmem:[#allocation2 + $0x300] ss:$16 sps:$4 sm:$0xff]  }
 0x15f   :  { %v521_v4 = vadd.f32 %v513_v63, %v497_v51  ;;  %v517_v1 = vadd.f32 %v513_v63, %v493_v50  ;;  %v4973_v46 = vld [vmem:[#allocation2 + $0x308] ss:$16 sps:$4 sm:$0xff]   ;;  %v4978_v47 = vld [vmem:[#allocation2 + $0x324] ss:$16 sps:$4 sm:$0xff]   ;;  %v4981_v48 = vld [vmem:[#allocation2 + $0x32c] ss:$16 sps:$4 sm:$0xff]  }
 0x160   :  { %v528_v6 = vmax.f32 %v520_v0, 0.0  ;;  %1334 = vmatprep.mubr.bf16.mxu0 %v531_v60  ;;  %1420 = vmatprep.mubr.bf16.mxu1 %v531_v60  ;;  %v524_v8 = vmax.f32 %v516_v52, 0.0  ;;  %v4976_v49 = vld [vmem:[#allocation2 + $0x320] ss:$16 sps:$4 sm:$0xff]   ;;  %v4979_v50 = vld [vmem:[#allocation2 + $0x328] ss:$16 sps:$4 sm:$0xff]  }
 0x161   :  { %1335 = vmatmul.mubr.bf16.vlgmr.msra.gmra.mrb[4].mxu0 %v530_v62  ;;  %1421 = vmatmul.mubr.bf16.vlgmr.msra.gmra.mrb[4].mxu1 %v530_v62  ;;  %v525_v9 = vmax.f32 %v517_v1, 0.0  ;;  %v529_v11 = vmax.f32 %v521_v4, 0.0  ;;  %v4984_v51 = vld [vmem:[#allocation2 + $0x344] ss:$16 sps:$4 sm:$0xff]   ;;  %v4987_v53 = vld [vmem:[#allocation2 + $0x34c] ss:$16 sps:$4 sm:$0xff]  }
 0x162   :  { %1346 = vmatpush1.bf16.msra.mxu0 %v4922_v2  ;;  %1432 = vmatpush1.bf16.msra.mxu1 %v4925_v3  ;;  %v5857_v15 = vpack.c.bf16 %v528_v6, %v524_v8  ;;  %v4982_v54 = vld [vmem:[#allocation2 + $0x340] ss:$16 sps:$4 sm:$0xff]   ;;  %v4985_v55 = vld [vmem:[#allocation2 + $0x348] ss:$16 sps:$4 sm:$0xff]   ;;  %v4990_v57 = vld [vmem:[#allocation2 + $0x364] ss:$16 sps:$4 sm:$0xff]  }
 0x163   :  { %1347 = vmatprep.subr.bf16.mxu0 %v4930_v56  ;;  %1433 = vmatprep.subr.bf16.mxu1 %v4933_v5  ;;  %v533_v18 = vpack.c.bf16 %v529_v11, %v525_v9  ;;  %v4993_v58 = vld [vmem:[#allocation2 + $0x36c] ss:$16 sps:$4 sm:$0xff]   ;;  %v4988_v59 = vld [vmem:[#allocation2 + $0x360] ss:$16 sps:$4 sm:$0xff]   ;;  %v4991_v61 = vld [vmem:[#allocation2 + $0x368] ss:$16 sps:$4 sm:$0xff]  }
 0x164   :  { %v4996_v62 = vld [vmem:[#allocation2 + $0x384] ss:$16 sps:$4 sm:$0xff]   ;;  %v4999_v63 = vld [vmem:[#allocation2 + $0x38c] ss:$16 sps:$4 sm:$0xff]   ;;  %v4994_v52 = vld [vmem:[#allocation2 + $0x380] ss:$16 sps:$4 sm:$0xff]  }
 0x165   :  { %1377 = vmatprep.mubr.bf16.mxu0 %v533_v18  ;;  %1463 = vmatprep.mubr.bf16.mxu1 %v533_v18  ;;  %v4997_v0 = vld [vmem:[#allocation2 + $0x388] ss:$16 sps:$4 sm:$0xff]   ;;  %v5002_v60 = vld [vmem:[#allocation2 + $0x3a4] ss:$16 sps:$4 sm:$0xff]   ;;  %v5005_v2 = vld [vmem:[#allocation2 + $0x3ac] ss:$16 sps:$4 sm:$0xff]  }
 0x166   :  { %1348 = vmatpush1.bf16.msra.mxu0 %v4928_v13  ;;  %1434 = vmatpush1.bf16.msra.mxu1 %v4931_v14  ;;  %v5000_v3 = vld [vmem:[#allocation2 + $0x3a0] ss:$16 sps:$4 sm:$0xff]   ;;  %v5003_v4 = vld [vmem:[#allocation2 + $0x3a8] ss:$16 sps:$4 sm:$0xff]   ;;  %v5008_v56 = vld [vmem:[#allocation2 + $0x3c4] ss:$16 sps:$4 sm:$0xff]  }
 0x167   :  { %1349 = vmatprep.subr.bf16.mxu0 %v4936_v16  ;;  %1435 = vmatprep.subr.bf16.mxu1 %v4939_v17  ;;  %v5011_v5 = vld [vmem:[#allocation2 + $0x3cc] ss:$16 sps:$4 sm:$0xff]   ;;  %v5006_v1 = vld [vmem:[#allocation2 + $0x3c0] ss:$16 sps:$4 sm:$0xff]   ;;  %v5009_v6 = vld [vmem:[#allocation2 + $0x3c8] ss:$16 sps:$4 sm:$0xff]  }
 0x168   :  { %v5014_v8 = vld [vmem:[#allocation2 + $0x3e4] ss:$16 sps:$4 sm:$0xff]   ;;  %v5017_v9 = vld [vmem:[#allocation2 + $0x3ec] ss:$16 sps:$4 sm:$0xff]   ;;  %v5012_v11 = vld [vmem:[#allocation2 + $0x3e0] ss:$16 sps:$4 sm:$0xff]  }
 0x169   :  { %v5015_v13 = vld [vmem:[#allocation2 + $0x3e8] ss:$16 sps:$4 sm:$0xff]   ;;  %v5020_v14 = vld [vmem:[#allocation5 + $0x4] ss:$16 sps:$4 sm:$0xff]   ;;  %v5023_v16 = vld [vmem:[#allocation5 + $0xc] ss:$16 sps:$4 sm:$0xff]  }
 0x16a   :  { %1350 = vmatpush1.bf16.msra.mxu0 %v4934_v19  ;;  %1436 = vmatpush1.bf16.msra.mxu1 %v4937_v20  ;;  %v5018_v17 = vld [vmem:[#allocation5] ss:$16 sps:$4 sm:$0xff]   ;;  %v5021_v18 = vld [vmem:[#allocation5 + $0x8] ss:$16 sps:$4 sm:$0xff]   ;;  %v5026_v19 = vld [vmem:[#allocation5 + $0x24] ss:$16 sps:$4 sm:$0xff]  }
 0x16b   :  { %1351 = vmatprep.subr.bf16.mxu0 %v4942_v21  ;;  %1437 = vmatprep.subr.bf16.mxu1 %v4945_v22  ;;  %v5029_v20 = vld [vmem:[#allocation5 + $0x2c] ss:$16 sps:$4 sm:$0xff]   ;;  %v5024_v21 = vld [vmem:[#allocation5 + $0x20] ss:$16 sps:$4 sm:$0xff]   ;;  %v5027_v22 = vld [vmem:[#allocation5 + $0x28] ss:$16 sps:$4 sm:$0xff]  }
 0x16e   :  { %1352 = vmatpush1.bf16.msra.mxu0 %v4940_v23  ;;  %1438 = vmatpush1.bf16.msra.mxu1 %v4943_v24  ;;  %v5032_v23 = vld [vmem:[#allocation5 + $0x44] ss:$16 sps:$4 sm:$0xff]   ;;  %v5035_v24 = vld [vmem:[#allocation5 + $0x4c] ss:$16 sps:$4 sm:$0xff]  }
 0x16f   :  { %1353 = vmatprep.subr.bf16.mxu0 %v4948_v27  ;;  %1439 = vmatprep.subr.bf16.mxu1 %v4951_v28  ;;  %v5030_v27 = vld [vmem:[#allocation5 + $0x40] ss:$16 sps:$4 sm:$0xff]   ;;  %v5033_v28 = vld [vmem:[#allocation5 + $0x48] ss:$16 sps:$4 sm:$0xff]  }
 0x172   :  { %1354 = vmatpush1.bf16.msra.mxu0 %v4946_v26  ;;  %1440 = vmatpush1.bf16.msra.mxu1 %v4949_v36  ;;  %v5038_v26 = vld [vmem:[#allocation5 + $0x64] ss:$16 sps:$4 sm:$0xff]   ;;  %v5041_v36 = vld [vmem:[#allocation5 + $0x6c] ss:$16 sps:$4 sm:$0xff]  }
 0x173   :  { %1355 = vmatprep.subr.bf16.mxu0 %v4954_v38  ;;  %1441 = vmatprep.subr.bf16.mxu1 %v4957_v30  ;;  %v5036_v38 = vld [vmem:[#allocation5 + $0x60] ss:$16 sps:$4 sm:$0xff]   ;;  %v5044_v30 = vld [vmem:[#allocation5 + $0x84] ss:$16 sps:$4 sm:$0xff]  }
 0x176   :  { %1356 = vmatpush1.bf16.msra.mxu0 %v4952_v31  ;;  %1442 = vmatpush1.bf16.msra.mxu1 %v4955_v32  ;;  %v5047_v31 = vld [vmem:[#allocation5 + $0x8c] ss:$16 sps:$4 sm:$0xff]   ;;  %v5042_v32 = vld [vmem:[#allocation5 + $0x80] ss:$16 sps:$4 sm:$0xff]  }
 0x177   :  { %1357 = vmatprep.subr.bf16.mxu0 %v4960_v33  ;;  %1443 = vmatprep.subr.bf16.mxu1 %v4963_v34  ;;  %v5045_v33 = vld [vmem:[#allocation5 + $0x88] ss:$16 sps:$4 sm:$0xff]   ;;  %v5050_v34 = vld [vmem:[#allocation5 + $0xa4] ss:$16 sps:$4 sm:$0xff]  }
 0x17a   :  { %1358 = vmatpush1.bf16.msra.mxu0 %v4958_v35  ;;  %1444 = vmatpush1.bf16.msra.mxu1 %v4961_v37  ;;  %v5053_v35 = vld [vmem:[#allocation5 + $0xac] ss:$16 sps:$4 sm:$0xff]   ;;  %v5048_v37 = vld [vmem:[#allocation5 + $0xa0] ss:$16 sps:$4 sm:$0xff]  }
 0x17b   :  { %1359 = vmatprep.subr.bf16.mxu0 %v4966_v39  ;;  %1445 = vmatprep.subr.bf16.mxu1 %v4969_v42  ;;  %v5051_v39 = vld [vmem:[#allocation5 + $0xa8] ss:$16 sps:$4 sm:$0xff]   ;;  %v5056_v42 = vld [vmem:[#allocation5 + $0xc4] ss:$16 sps:$4 sm:$0xff]  }
 0x17e   :  { %1360 = vmatpush1.bf16.msra.mxu0 %v4964_v40  ;;  %1446 = vmatpush1.bf16.msra.mxu1 %v4967_v41  ;;  %v5059_v40 = vld [vmem:[#allocation5 + $0xcc] ss:$16 sps:$4 sm:$0xff]   ;;  %v5054_v41 = vld [vmem:[#allocation5 + $0xc0] ss:$16 sps:$4 sm:$0xff]  }
 0x17f   :  { %1361 = vmatprep.subr.bf16.mxu0 %v4972_v43  ;;  %1447 = vmatprep.subr.bf16.mxu1 %v4975_v44  ;;  %v5057_v43 = vld [vmem:[#allocation5 + $0xc8] ss:$16 sps:$4 sm:$0xff]   ;;  %v5062_v44 = vld [vmem:[#allocation5 + $0xe4] ss:$16 sps:$4 sm:$0xff]  }
 0x182   :  { %1362 = vmatpush1.bf16.msra.mxu0 %v4970_v45  ;;  %1448 = vmatpush1.bf16.msra.mxu1 %v4973_v46  ;;  %v5065_v45 = vld [vmem:[#allocation5 + $0xec] ss:$16 sps:$4 sm:$0xff]   ;;  %v5060_v46 = vld [vmem:[#allocation5 + $0xe0] ss:$16 sps:$4 sm:$0xff]  }
 0x183   :  { %1363 = vmatprep.subr.bf16.mxu0 %v4978_v47  ;;  %1449 = vmatprep.subr.bf16.mxu1 %v4981_v48  ;;  %v5063_v47 = vld [vmem:[#allocation5 + $0xe8] ss:$16 sps:$4 sm:$0xff]   ;;  %v5068_v48 = vld [vmem:[#allocation5 + $0x104] ss:$16 sps:$4 sm:$0xff]  }
 0x186   :  { %1364 = vmatpush1.bf16.msra.mxu0 %v4976_v49  ;;  %1450 = vmatpush1.bf16.msra.mxu1 %v4979_v50  ;;  %v5071_v49 = vld [vmem:[#allocation5 + $0x10c] ss:$16 sps:$4 sm:$0xff]   ;;  %v5066_v50 = vld [vmem:[#allocation5 + $0x100] ss:$16 sps:$4 sm:$0xff]  }
 0x187   :  { %1365 = vmatprep.subr.bf16.mxu0 %v4984_v51  ;;  %1451 = vmatprep.subr.bf16.mxu1 %v4987_v53  ;;  %v5069_v51 = vld [vmem:[#allocation5 + $0x108] ss:$16 sps:$4 sm:$0xff]   ;;  %v5074_v53 = vld [vmem:[#allocation5 + $0x124] ss:$16 sps:$4 sm:$0xff]  }
 0x18a   :  { %1366 = vmatpush1.bf16.msra.mxu0 %v4982_v54  ;;  %1452 = vmatpush1.bf16.msra.mxu1 %v4985_v55  ;;  %v5077_v54 = vld [vmem:[#allocation5 + $0x12c] ss:$16 sps:$4 sm:$0xff]   ;;  %v5072_v55 = vld [vmem:[#allocation5 + $0x120] ss:$16 sps:$4 sm:$0xff]  }
 0x18b   :  { %1367 = vmatprep.subr.bf16.mxu0 %v4990_v57  ;;  %1453 = vmatprep.subr.bf16.mxu1 %v4993_v58  ;;  %v5075_v57 = vld [vmem:[#allocation5 + $0x128] ss:$16 sps:$4 sm:$0xff]   ;;  %v5080_v58 = vld [vmem:[#allocation5 + $0x144] ss:$16 sps:$4 sm:$0xff]  }
 0x18e   :  { %1368 = vmatpush1.bf16.msra.mxu0 %v4988_v59  ;;  %1454 = vmatpush1.bf16.msra.mxu1 %v4991_v61  ;;  %v5083_v59 = vld [vmem:[#allocation5 + $0x14c] ss:$16 sps:$4 sm:$0xff]   ;;  %v5078_v61 = vld [vmem:[#allocation5 + $0x140] ss:$16 sps:$4 sm:$0xff]  }
 0x18f   :  { %1369 = vmatprep.subr.bf16.mxu0 %v4996_v62  ;;  %1455 = vmatprep.subr.bf16.mxu1 %v4999_v63  ;;  %v5081_v62 = vld [vmem:[#allocation5 + $0x148] ss:$16 sps:$4 sm:$0xff]   ;;  %v5086_v63 = vld [vmem:[#allocation5 + $0x164] ss:$16 sps:$4 sm:$0xff]  }
 0x192   :  { %1370 = vmatpush1.bf16.msra.mxu0 %v4994_v52  ;;  %1456 = vmatpush1.bf16.msra.mxu1 %v4997_v0  ;;  %v5089_v52 = vld [vmem:[#allocation5 + $0x16c] ss:$16 sps:$4 sm:$0xff]   ;;  %v5084_v0 = vld [vmem:[#allocation5 + $0x160] ss:$16 sps:$4 sm:$0xff]  }
 0x193   :  { %1371 = vmatprep.subr.bf16.mxu0 %v5002_v60  ;;  %1457 = vmatprep.subr.bf16.mxu1 %v5005_v2  ;;  %v5087_v60 = vld [vmem:[#allocation5 + $0x168] ss:$16 sps:$4 sm:$0xff]   ;;  %v5092_v2 = vld [vmem:[#allocation5 + $0x184] ss:$16 sps:$4 sm:$0xff]  }
 0x196   :  { %1372 = vmatpush1.bf16.msra.mxu0 %v5000_v3  ;;  %1458 = vmatpush1.bf16.msra.mxu1 %v5003_v4  ;;  %v5095_v3 = vld [vmem:[#allocation5 + $0x18c] ss:$16 sps:$4 sm:$0xff]   ;;  %v5090_v4 = vld [vmem:[#allocation5 + $0x180] ss:$16 sps:$4 sm:$0xff]  }
 0x197   :  { %1373 = vmatprep.subr.bf16.mxu0 %v5008_v56  ;;  %1459 = vmatprep.subr.bf16.mxu1 %v5011_v5  ;;  %v5093_v56 = vld [vmem:[#allocation5 + $0x188] ss:$16 sps:$4 sm:$0xff]   ;;  %v5098_v5 = vld [vmem:[#allocation5 + $0x1a4] ss:$16 sps:$4 sm:$0xff]  }
 0x19a   :  { %1374 = vmatpush1.bf16.msra.mxu0 %v5006_v1  ;;  %1460 = vmatpush1.bf16.msra.mxu1 %v5009_v6  ;;  %v5101_v1 = vld [vmem:[#allocation5 + $0x1ac] ss:$16 sps:$4 sm:$0xff]   ;;  %v5096_v6 = vld [vmem:[#allocation5 + $0x1a0] ss:$16 sps:$4 sm:$0xff]  }
 0x19b   :  { %1375 = vmatprep.subr.bf16.mxu0 %v5014_v8  ;;  %1461 = vmatprep.subr.bf16.mxu1 %v5017_v9  ;;  %v5099_v8 = vld [vmem:[#allocation5 + $0x1a8] ss:$16 sps:$4 sm:$0xff]   ;;  %v5104_v9 = vld [vmem:[#allocation5 + $0x1c4] ss:$16 sps:$4 sm:$0xff]  }
 0x19e   :  { %1376 = vmatpush1.bf16.msra.mxu0 %v5012_v11  ;;  %1462 = vmatpush1.bf16.msra.mxu1 %v5015_v13  ;;  %v5107_v11 = vld [vmem:[#allocation5 + $0x1cc] ss:$16 sps:$4 sm:$0xff]   ;;  %v5102_v13 = vld [vmem:[#allocation5 + $0x1c0] ss:$16 sps:$4 sm:$0xff]  }
 0x19f   :  { %2414 = vmatprep.subr.bf16.mxu0 %v5020_v14  ;;  %2500 = vmatprep.subr.bf16.mxu1 %v5023_v16  ;;  %v5105_v14 = vld [vmem:[#allocation5 + $0x1c8] ss:$16 sps:$4 sm:$0xff]   ;;  %v5108_v16 = vld [vmem:[#allocation5 + $0x1e0] ss:$16 sps:$4 sm:$0xff]  }
 0x1a1   :  { %1378 = vmatmul.mubr.bf16.vlgmr.msra.gmra.mrb[4].mxu0 %v5857_v15  ;;  %1464 = vmatmul.mubr.bf16.vlgmr.msra.gmra.mrb[4].mxu1 %v5857_v15  ;;  %v5039_v15 = vld [vmem:[#allocation5 + $0x68] ss:$16 sps:$4 sm:$0xff]  }
 0x1a2   :  { %2415 = vmatpush1.bf16.msra.mxu0 %v5018_v17  ;;  %2501 = vmatpush1.bf16.msra.mxu1 %v5021_v18  ;;  %v5110_v17 = vld [vmem:[#allocation5 + $0x1e4] ss:$16 sps:$4 sm:$0xff]   ;;  %v5111_v18 = vld [vmem:[#allocation5 + $0x1e8] ss:$16 sps:$4 sm:$0xff]  }
 0x1a3   :  { %2416 = vmatprep.subr.bf16.mxu0 %v5026_v19  ;;  %2502 = vmatprep.subr.bf16.mxu1 %v5029_v20  ;;  %v5113_v19 = vld [vmem:[#allocation5 + $0x1ec] ss:$16 sps:$4 sm:$0xff]   ;;  %v5116_v20 = vld [vmem:[#allocation5 + $0x204] ss:$16 sps:$4 sm:$0xff]  }
 0x1a6   :  { %2417 = vmatpush1.bf16.msra.mxu0 %v5024_v21  ;;  %2503 = vmatpush1.bf16.msra.mxu1 %v5027_v22  ;;  %v5119_v21 = vld [vmem:[#allocation5 + $0x20c] ss:$16 sps:$4 sm:$0xff]  }
 0x1a7   :  { %2418 = vmatprep.subr.bf16.mxu0 %v5032_v23  ;;  %2504 = vmatprep.subr.bf16.mxu1 %v5035_v24 }
 0x1aa   :  { %2419 = vmatpush1.bf16.msra.mxu0 %v5030_v27  ;;  %2505 = vmatpush1.bf16.msra.mxu1 %v5033_v28 }
 0x1ab   :  { %2420 = vmatprep.subr.bf16.mxu0 %v5038_v26  ;;  %2506 = vmatprep.subr.bf16.mxu1 %v5041_v36 }
 0x1ae   :  { %2421 = vmatpush1.bf16.msra.mxu0 %v5036_v38  ;;  %2507 = vmatpush1.bf16.msra.mxu1 %v5039_v15 }
 0x1af   :  { %2422 = vmatprep.subr.bf16.mxu0 %v5044_v30  ;;  %2508 = vmatprep.subr.bf16.mxu1 %v5047_v31 }
 0x1b2   :  { %2423 = vmatpush1.bf16.msra.mxu0 %v5042_v32  ;;  %2509 = vmatpush1.bf16.msra.mxu1 %v5045_v33 }
 0x1b3   :  { %2424 = vmatprep.subr.bf16.mxu0 %v5050_v34  ;;  %2510 = vmatprep.subr.bf16.mxu1 %v5053_v35 }
 0x1b6   :  { %2425 = vmatpush1.bf16.msra.mxu0 %v5048_v37  ;;  %2511 = vmatpush1.bf16.msra.mxu1 %v5051_v39 }
 0x1b7   :  { %2426 = vmatprep.subr.bf16.mxu0 %v5056_v42  ;;  %2512 = vmatprep.subr.bf16.mxu1 %v5059_v40 }
 0x1ba   :  { %2427 = vmatpush1.bf16.msra.mxu0 %v5054_v41  ;;  %2513 = vmatpush1.bf16.msra.mxu1 %v5057_v43 }
 0x1bb   :  { %2428 = vmatprep.subr.bf16.mxu0 %v5062_v44  ;;  %2514 = vmatprep.subr.bf16.mxu1 %v5065_v45 }
 0x1be   :  { %2429 = vmatpush1.bf16.msra.mxu0 %v5060_v46  ;;  %2515 = vmatpush1.bf16.msra.mxu1 %v5063_v47 }
 0x1bf   :  { %2430 = vmatprep.subr.bf16.mxu0 %v5068_v48  ;;  %2516 = vmatprep.subr.bf16.mxu1 %v5071_v49 }
 0x1c2   :  { %2431 = vmatpush1.bf16.msra.mxu0 %v5066_v50  ;;  %2517 = vmatpush1.bf16.msra.mxu1 %v5069_v51 }
 0x1c3   :  { %2432 = vmatprep.subr.bf16.mxu0 %v5074_v53  ;;  %2518 = vmatprep.subr.bf16.mxu1 %v5077_v54 }
 0x1c6   :  { %2433 = vmatpush1.bf16.msra.mxu0 %v5072_v55  ;;  %2519 = vmatpush1.bf16.msra.mxu1 %v5075_v57 }
 0x1c7   :  { %2434 = vmatprep.subr.bf16.mxu0 %v5080_v58  ;;  %2520 = vmatprep.subr.bf16.mxu1 %v5083_v59 }
 0x1ca   :  { %2435 = vmatpush1.bf16.msra.mxu0 %v5078_v61  ;;  %2521 = vmatpush1.bf16.msra.mxu1 %v5081_v62 }
 0x1cb   :  { %2436 = vmatprep.subr.bf16.mxu0 %v5086_v63  ;;  %2522 = vmatprep.subr.bf16.mxu1 %v5089_v52 }
 0x1ce   :  { %2437 = vmatpush1.bf16.msra.mxu0 %v5084_v0  ;;  %2523 = vmatpush1.bf16.msra.mxu1 %v5087_v60 }
 0x1cf   :  { %2438 = vmatprep.subr.bf16.mxu0 %v5092_v2  ;;  %2524 = vmatprep.subr.bf16.mxu1 %v5095_v3 }
 0x1d2   :  { %2439 = vmatpush1.bf16.msra.mxu0 %v5090_v4  ;;  %2525 = vmatpush1.bf16.msra.mxu1 %v5093_v56 }
 0x1d3   :  { %2440 = vmatprep.subr.bf16.mxu0 %v5098_v5  ;;  %2526 = vmatprep.subr.bf16.mxu1 %v5101_v1 }
 0x1d6   :  { %2441 = vmatpush1.bf16.msra.mxu0 %v5096_v6  ;;  %2527 = vmatpush1.bf16.msra.mxu1 %v5099_v8 }
 0x1d7   :  { %2442 = vmatprep.subr.bf16.mxu0 %v5104_v9  ;;  %2528 = vmatprep.subr.bf16.mxu1 %v5107_v11 }
 0x1da   :  { %2443 = vmatpush1.bf16.msra.mxu0 %v5102_v13  ;;  %2529 = vmatpush1.bf16.msra.mxu1 %v5105_v14 }
 0x1db   :  { %2444 = vmatprep.subr.bf16.mxu0 %v5110_v17  ;;  %2530 = vmatprep.subr.bf16.mxu1 %v5113_v19 }
 0x1de   :  { %2445 = vmatpush1.bf16.msra.mxu0 %v5108_v16  ;;  %2531 = vmatpush1.bf16.msra.mxu1 %v5111_v18 }
 0x1df   :  { %2457 = vmatprep.subr.bf16.mxu0 %v5116_v20  ;;  %2543 = vmatprep.subr.bf16.mxu1 %v5119_v21 }
 0x274   :  { %v5861_v22 = vpop.f32.mrb[4].mxu0  ;;  %v5863_v23 = vpop.f32.mrb[4].mxu1 }
 0x275   :  { %v5865_v24 = vpop.f32.mrb[5].mxu0  ;;  %v5867_v27 = vpop.f32.mrb[5].mxu1  ;;  %v1506_v28 = vmul.f32 %v5861_v22, %v5861_v22  ;;  %v1508_v26 = vmul.f32 %v5863_v23, %v5863_v23 }
 0x276   :  { %v1507_v36 = vmul.f32 %v5865_v24, %v5865_v24  ;;  %v1509_v38 = vmul.f32 %v5867_v27, %v5867_v27  ;;  %v5877_v15 = vpop.f32.mrb[6].mxu0  ;;  %v5879_v30 = vpop.f32.mrb[6].mxu1 }
 0x277   :  { %v1474_v31 = vadd.f32 %v5877_v15, %v5861_v22  ;;  %v1510_v32 = vmul.f32 %v5877_v15, %v5877_v15  ;;  %v1488_v33 = vadd.f32 %v5879_v30, %v5863_v23  ;;  %v1512_v34 = vmul.f32 %v5879_v30, %v5879_v30  ;;  %v5889_v35 = vpop.f32.mrb[7].mxu0  ;;  %v5891_v37 = vpop.f32.mrb[7].mxu1 }
 0x278   :  { %v1481_v39 = vadd.f32 %v5889_v35, %v5865_v24  ;;  %v1511_v42 = vmul.f32 %v5889_v35, %v5889_v35  ;;  %v1495_v40 = vadd.f32 %v5891_v37, %v5867_v27  ;;  %v1513_v41 = vmul.f32 %v5891_v37, %v5891_v37 }
 0x279   :  { %v1475_v43 = vrot.slane %v1474_v31, 4  ;;  %v1514_v44 = vadd.f32 %v1510_v32, %v1506_v28  ;;  %v1489_v45 = vrot.slane %v1488_v33, 4  ;;  %v1528_v46 = vadd.f32 %v1512_v34, %v1508_v26 }
 0x27a   :  { %v1482_v47 = vrot.slane %v1481_v39, 4  ;;  %v1521_v48 = vadd.f32 %v1511_v42, %v1507_v36  ;;  %v1496_v49 = vrot.slane %v1495_v40, 4  ;;  %v1535_v50 = vadd.f32 %v1513_v41, %v1509_v38 }
 0x27b   :  { %v1476_v51 = vadd.f32 %v1475_v43, %v1474_v31  ;;  %v1515_v53 = vrot.slane %v1514_v44, 4  ;;  %v1490_v54 = vadd.f32 %v1489_v45, %v1488_v33  ;;  %v1529_v55 = vrot.slane %v1528_v46, 4 }
 0x27c   :  { %v1483_v57 = vadd.f32 %v1482_v47, %v1481_v39  ;;  %v1522_v58 = vrot.slane %v1521_v48, 4  ;;  %v1497_v59 = vadd.f32 %v1496_v49, %v1495_v40  ;;  %v1536_v61 = vrot.slane %v1535_v50, 4 }
 0x27d   :  { %v1477_v62 = vrot.slane %v1476_v51, 2  ;;  %v1516_v63 = vadd.f32 %v1515_v53, %v1514_v44  ;;  %v1491_v52 = vrot.slane %v1490_v54, 2  ;;  %v1530_v0 = vadd.f32 %v1529_v55, %v1528_v46 }
 0x27e   :  { %v1484_v60 = vrot.slane %v1483_v57, 2  ;;  %v1523_v2 = vadd.f32 %v1522_v58, %v1521_v48  ;;  %v1498_v3 = vrot.slane %v1497_v59, 2  ;;  %v1537_v4 = vadd.f32 %v1536_v61, %v1535_v50 }
 0x27f   :  { %v1478_v56 = vadd.f32 %v1477_v62, %v1476_v51  ;;  %v1517_v5 = vrot.slane %v1516_v63, 2  ;;  %v1492_v1 = vadd.f32 %v1491_v52, %v1490_v54  ;;  %v1531_v6 = vrot.slane %v1530_v0, 2 }
 0x280   :  { %v1485_v8 = vadd.f32 %v1484_v60, %v1483_v57  ;;  %v1524_v9 = vrot.slane %v1523_v2, 2  ;;  %v1499_v11 = vadd.f32 %v1498_v3, %v1497_v59  ;;  %v1538_v13 = vrot.slane %v1537_v4, 2 }
 0x281   :  { %v1479_v14 = vrot.slane %v1478_v56, 1  ;;  %v1518_v16 = vadd.f32 %v1517_v5, %v1516_v63  ;;  %v1493_v17 = vrot.slane %v1492_v1, 1  ;;  %v1532_v18 = vadd.f32 %v1531_v6, %v1530_v0 }
 0x282   :  { %v1486_v19 = vrot.slane %v1485_v8, 1  ;;  %v1525_v20 = vadd.f32 %v1524_v9, %v1523_v2  ;;  %v1500_v21 = vrot.slane %v1499_v11, 1  ;;  %v1539_v28 = vadd.f32 %v1538_v13, %v1537_v4 }
 0x283   :  { %v1480_v26 = vadd.f32 %v1479_v14, %v1478_v56  ;;  %v1519_v36 = vrot.slane %v1518_v16, 1  ;;  %v1494_v38 = vadd.f32 %v1493_v17, %v1492_v1  ;;  %v1533_v31 = vrot.slane %v1532_v18, 1 }
 0x284   :  { %v1487_v32 = vadd.f32 %v1486_v19, %v1485_v8  ;;  %v1526_v33 = vrot.slane %v1525_v20, 1  ;;  %v1501_v34 = vadd.f32 %v1500_v21, %v1499_v11  ;;  %v1540_v39 = vrot.slane %v1539_v28, 1 }
 0x285   :  { %v1502_v42 = vmul.f32 0.0625, %v1480_v26  ;;  %v1520_v40 = vadd.f32 %v1519_v36, %v1518_v16  ;;  %v1504_v41 = vmul.f32 0.0625, %v1494_v38  ;;  %v1534_v43 = vadd.f32 %v1533_v31, %v1532_v18 }
 0x286   :  { %v1503_v44 = vmul.f32 0.0625, %v1487_v32  ;;  %v1527_v45 = vadd.f32 %v1526_v33, %v1525_v20  ;;  %v1505_v46 = vmul.f32 0.0625, %v1501_v34  ;;  %v1541_v47 = vadd.f32 %v1540_v39, %v1539_v28 }
 0x287   :  { %v1542_v48 = vmul.f32 0.0625, %v1520_v40  ;;  %v1546_v49 = vmul.f32 %v1502_v42, %v1502_v42  ;;  %v1544_v50 = vmul.f32 0.0625, %v1534_v43  ;;  %v1548_v51 = vmul.f32 %v1504_v41, %v1504_v41 }
 0x288   :  { %v1543_v53 = vmul.f32 0.0625, %v1527_v45  ;;  %v1547_v54 = vmul.f32 %v1503_v44, %v1503_v44  ;;  %v1545_v55 = vmul.f32 0.0625, %v1541_v47  ;;  %v1549_v57 = vmul.f32 %v1505_v46, %v1505_v46 }
 0x289   :  { %v1550_v58 = vsub.f32 %v1542_v48, %v1546_v49  ;;  %v1552_v59 = vsub.f32 %v1544_v50, %v1548_v51  ;;  %v1588_v2 = vsub.s32 1, %v5817_v7  ;;  %v1612_v13 = vsub.s32 5, %v5817_v7 }
 0x28a   :  { %v1551_v61 = vsub.f32 %v1543_v53, %v1547_v54  ;;  %v1553_v62 = vsub.f32 %v1545_v55, %v1549_v57 }
 0x28b   :  { %v1554_v63 = vadd.f32 1e-05, %v1550_v58  ;;  %v1556_v52 = vadd.f32 1e-05, %v1552_v59  ;;  %v5114_v59 = vld [vmem:[#allocation5 + $0x200] ss:$16 sps:$4 sm:$0xff]  }
 0x28c   :  { %v1555_v0 = vadd.f32 1e-05, %v1551_v61  ;;  %v1557_v60 = vadd.f32 1e-05, %v1553_v62  ;;  %v5117_v61 = vld [vmem:[#allocation5 + $0x208] ss:$16 sps:$4 sm:$0xff]  }
 0x28d   :  { %5442 = vrsqrt.f32 %v1554_v63 }
 0x28e   :  { %5444 = vrsqrt.f32 %v1556_v52  ;;  %v5122_v52 = vld [vmem:[#allocation5 + $0x224] ss:$16 sps:$4 sm:$0xff]  }
 0x28f   :  { %5446 = vrsqrt.f32 %v1555_v0  ;;  %v5125_v0 = vld [vmem:[#allocation5 + $0x22c] ss:$16 sps:$4 sm:$0xff]  }
 0x290   :  { %5448 = vrsqrt.f32 %v1557_v60  ;;  %v5120_v60 = vld [vmem:[#allocation5 + $0x220] ss:$16 sps:$4 sm:$0xff]  }
 0x297   :  { %v5443_v3 = vpop.eup %5442 }
 0x298   :  { %v5445_v4 = vpop.eup %5444  ;;  %v1562_v56 = vmul.f32 %v5443_v3, %v5822_v10  ;;  %v5128_v3 = vld [vmem:[#allocation5 + $0x244] ss:$16 sps:$4 sm:$0xff]  }
 0x299   :  { %v5447_v5 = vpop.eup %5446  ;;  %v1564_v1 = vmul.f32 %v5445_v4, %v5838_v25  ;;  %v5131_v4 = vld [vmem:[#allocation5 + $0x24c] ss:$16 sps:$4 sm:$0xff]  }
 0x29a   :  { %v5449_v6 = vpop.eup %5448  ;;  %v1566_v8 = vmul.f32 %v1562_v56, %v1502_v42  ;;  %v1589_v9 = vrot.slane %v1562_v56, %v1588_v2  ;;  %v1563_v11 = vmul.f32 %v5447_v5, %v5828_v12  ;;  %v5126_v56 = vld [vmem:[#allocation5 + $0x240] ss:$16 sps:$4 sm:$0xff]   ;;  %v5129_v5 = vld [vmem:[#allocation5 + $0x248] ss:$16 sps:$4 sm:$0xff]  }
 0x29b   :  { %v1568_v14 = vmul.f32 %v1564_v1, %v1504_v41  ;;  %v1597_v16 = vrot.slane %v1564_v1, %v1588_v2  ;;  %v1565_v17 = vmul.f32 %v5449_v6, %v5845_v29  ;;  %v5134_v1 = vld [vmem:[#allocation5 + $0x264] ss:$16 sps:$4 sm:$0xff]   ;;  %v5137_v6 = vld [vmem:[#allocation5 + $0x26c] ss:$16 sps:$4 sm:$0xff]  }
 0x29c   :  { %v1574_v18 = vrot.slane %v1566_v8, 4  ;;  %v1602_v19 = vmul.f32 %v1589_v9, %v5861_v22  ;;  %v1606_v20 = vmul.f32 %v1589_v9, %v5877_v15  ;;  %v1567_v21 = vmul.f32 %v1563_v11, %v1503_v44  ;;  %v5132_v8 = vld [vmem:[#allocation5 + $0x260] ss:$16 sps:$4 sm:$0xff]   ;;  %v5135_v9 = vld [vmem:[#allocation5 + $0x268] ss:$16 sps:$4 sm:$0xff]  }
 0x29d   :  { %v1576_v28 = vrot.slane %v1568_v14, 4  ;;  %v1604_v26 = vmul.f32 %v1597_v16, %v5863_v23  ;;  %v1608_v36 = vmul.f32 %v1597_v16, %v5879_v30  ;;  %v1593_v38 = vrot.slane %v1563_v11, %v1588_v2  ;;  %v5140_v11 = vld [vmem:[#allocation5 + $0x284] ss:$16 sps:$4 sm:$0xff]   ;;  %v5138_v14 = vld [vmem:[#allocation5 + $0x280] ss:$16 sps:$4 sm:$0xff]  }
 0x29e   :  { %v1582_v31 = vsub.f32 %v5822_v10, %v1574_v18  ;;  %v1575_v32 = vrot.slane %v1567_v21, 4  ;;  %v1569_v33 = vmul.f32 %v1565_v17, %v1505_v46  ;;  %v1601_v34 = vrot.slane %v1565_v17, %v1588_v2  ;;  %v5123_v2 = vld [vmem:[#allocation5 + $0x228] ss:$16 sps:$4 sm:$0xff]   ;;  %v5146_v17 = vld [vmem:[#allocation5 + $0x2a4] ss:$16 sps:$4 sm:$0xff]  }
 0x29f   :  { %v1584_v39 = vsub.f32 %v5838_v25, %v1576_v28  ;;  %v1603_v42 = vmul.f32 %v1593_v38, %v5865_v24  ;;  %v1607_v22 = vmul.f32 %v1593_v38, %v5889_v35  ;;  %v5141_v16 = vld [vmem:[#allocation5 + $0x288] ss:$16 sps:$4 sm:$0xff]   ;;  %v5149_v18 = vld [vmem:[#allocation5 + $0x2ac] ss:$16 sps:$4 sm:$0xff]   ;;  %v5152_v21 = vld [vmem:[#allocation5 + $0x2c4] ss:$16 sps:$4 sm:$0xff]  }
 0x2a0   :  { %v1613_v40 = vrot.slane %v1582_v31, %v1612_v13  ;;  %v1583_v15 = vsub.f32 %v5828_v12, %v1575_v32  ;;  %v1577_v41 = vrot.slane %v1569_v33, 4  ;;  %v1605_v23 = vmul.f32 %v1601_v34, %v5867_v27  ;;  %v5155_v28 = vld [vmem:[#allocation5 + $0x2cc] ss:$16 sps:$4 sm:$0xff]   ;;  %v5158_v38 = vld [vmem:[#allocation5 + $0x2e4] ss:$16 sps:$4 sm:$0xff]  }
 0x2a1   :  { %v1621_v43 = vrot.slane %v1584_v39, %v1612_v13  ;;  %v1609_v30 = vmul.f32 %v1601_v34, %v5891_v37  ;;  %v5161_v31 = vld [vmem:[#allocation5 + $0x2ec] ss:$16 sps:$4 sm:$0xff]   ;;  %v5156_v32 = vld [vmem:[#allocation5 + $0x2e0] ss:$16 sps:$4 sm:$0xff]   ;;  %v5159_v33 = vld [vmem:[#allocation5 + $0x2e8] ss:$16 sps:$4 sm:$0xff]  }
 0x2a2   :  { %v1626_v44 = vadd.f32 %v1613_v40, %v1602_v19  ;;  %v1630_v10 = vadd.f32 %v1613_v40, %v1606_v20  ;;  %v1617_v45 = vrot.slane %v1583_v15, %v1612_v13  ;;  %v1585_v46 = vsub.f32 %v5845_v29, %v1577_v41  ;;  %v5144_v19 = vld [vmem:[#allocation5 + $0x2a0] ss:$16 sps:$4 sm:$0xff]   ;;  %v5147_v20 = vld [vmem:[#allocation5 + $0x2a8] ss:$16 sps:$4 sm:$0xff]   ;;  %v5164_v34 = vld [vmem:[#allocation5 + $0x304] ss:$16 sps:$4 sm:$0xff]  }
 0x2a3   :  { %v1628_v47 = vadd.f32 %v1621_v43, %v1604_v26  ;;  %v1632_v25 = vadd.f32 %v1621_v43, %v1608_v36  ;;  %v5150_v26 = vld [vmem:[#allocation5 + $0x2c0] ss:$16 sps:$4 sm:$0xff]   ;;  %v5153_v36 = vld [vmem:[#allocation5 + $0x2c8] ss:$16 sps:$4 sm:$0xff]   ;;  %v5167_v39 = vld [vmem:[#allocation5 + $0x30c] ss:$16 sps:$4 sm:$0xff]  }
 0x2a4   :  { %v1638_v48 = vmax.f32 %v1630_v10, 0.0  ;;  %v1631_v24 = vadd.f32 %v1617_v45, %v1607_v22  ;;  %v1625_v49 = vrot.slane %v1585_v46, %v1612_v13  ;;  %v1627_v35 = vadd.f32 %v1617_v45, %v1603_v42  ;;  %v5143_v13 = vld [vmem:[#allocation5 + $0x28c] ss:$16 sps:$4 sm:$0xff]   ;;  %v5162_v42 = vld [vmem:[#allocation5 + $0x300] ss:$16 sps:$4 sm:$0xff]  }
 0x2a5   :  { %v1640_v50 = vmax.f32 %v1632_v25, 0.0  ;;  %v1634_v51 = vmax.f32 %v1626_v44, 0.0  ;;  %v1636_v12 = vmax.f32 %v1628_v47, 0.0  ;;  %v5165_v22 = vld [vmem:[#allocation5 + $0x308] ss:$16 sps:$4 sm:$0xff]  }
 0x2a6   :  { %v1633_v53 = vadd.f32 %v1625_v49, %v1609_v30  ;;  %v1635_v54 = vmax.f32 %v1627_v35, 0.0  ;;  %v1639_v27 = vmax.f32 %v1631_v24, 0.0  ;;  %v1629_v55 = vadd.f32 %v1625_v49, %v1605_v23  ;;  %v5170_v40 = vld [vmem:[#allocation5 + $0x324] ss:$16 sps:$4 sm:$0xff]   ;;  %v5173_v15 = vld [vmem:[#allocation5 + $0x32c] ss:$16 sps:$4 sm:$0xff]  }
 0x2a7   :  { %v1642_v57 = vpack.c.bf16 %v1638_v48, %v1634_v51  ;;  %v5919_v37 = vpack.c.bf16 %v1640_v50, %v1636_v12  ;;  %v5168_v41 = vld [vmem:[#allocation5 + $0x320] ss:$16 sps:$4 sm:$0xff]   ;;  %v5171_v23 = vld [vmem:[#allocation5 + $0x328] ss:$16 sps:$4 sm:$0xff]   ;;  %v5176_v43 = vld [vmem:[#allocation5 + $0x344] ss:$16 sps:$4 sm:$0xff]  }
 0x2a8   :  { %v1643_v58 = vpack.c.bf16 %v1639_v27, %v1635_v54  ;;  %v1637_v29 = vmax.f32 %v1629_v55, 0.0  ;;  %v1641_v62 = vmax.f32 %v1633_v53, 0.0  ;;  %v5179_v30 = vld [vmem:[#allocation5 + $0x34c] ss:$16 sps:$4 sm:$0xff]   ;;  %v5174_v44 = vld [vmem:[#allocation5 + $0x340] ss:$16 sps:$4 sm:$0xff]  }
 0x2a9   :  { %v5177_v10 = vld [vmem:[#allocation5 + $0x348] ss:$16 sps:$4 sm:$0xff]   ;;  %v5182_v45 = vld [vmem:[#allocation5 + $0x364] ss:$16 sps:$4 sm:$0xff]   ;;  %v5185_v46 = vld [vmem:[#allocation5 + $0x36c] ss:$16 sps:$4 sm:$0xff]  }
 0x2aa   :  { %2446 = vmatprep.mubr.bf16.mxu0 %v1643_v58  ;;  %2532 = vmatprep.mubr.bf16.mxu1 %v1643_v58  ;;  %v1645_v63 = vpack.c.bf16 %v1641_v62, %v1637_v29  ;;  %v5180_v47 = vld [vmem:[#allocation5 + $0x360] ss:$16 sps:$4 sm:$0xff]   ;;  %v5183_v25 = vld [vmem:[#allocation5 + $0x368] ss:$16 sps:$4 sm:$0xff]   ;;  %v5188_v48 = vld [vmem:[#allocation5 + $0x384] ss:$16 sps:$4 sm:$0xff]  }
 0x2ab   :  { %2447 = vmatmul.mubr.bf16.vlgmr.msra.gmra.mrb[8].mxu0 %v1642_v57  ;;  %2533 = vmatmul.mubr.bf16.vlgmr.msra.gmra.mrb[8].mxu1 %v1642_v57  ;;  %v5191_v24 = vld [vmem:[#allocation5 + $0x38c] ss:$16 sps:$4 sm:$0xff]   ;;  %v5186_v49 = vld [vmem:[#allocation5 + $0x380] ss:$16 sps:$4 sm:$0xff]   ;;  %v5189_v35 = vld [vmem:[#allocation5 + $0x388] ss:$16 sps:$4 sm:$0xff]  }
 0x2ac   :  { %2458 = vmatpush1.bf16.msra.mxu0 %v5114_v59  ;;  %2544 = vmatpush1.bf16.msra.mxu1 %v5117_v61  ;;  %v5194_v50 = vld [vmem:[#allocation5 + $0x3a4] ss:$16 sps:$4 sm:$0xff]   ;;  %v5197_v51 = vld [vmem:[#allocation5 + $0x3ac] ss:$16 sps:$4 sm:$0xff]   ;;  %v5192_v12 = vld [vmem:[#allocation5 + $0x3a0] ss:$16 sps:$4 sm:$0xff]  }
 0x2ad   :  { %2489 = vmatprep.mubr.bf16.mxu0 %v1645_v63  ;;  %2575 = vmatprep.mubr.bf16.mxu1 %v1645_v63  ;;  %v5195_v53 = vld [vmem:[#allocation5 + $0x3a8] ss:$16 sps:$4 sm:$0xff]   ;;  %v5200_v54 = vld [vmem:[#allocation5 + $0x3c4] ss:$16 sps:$4 sm:$0xff]   ;;  %v5203_v27 = vld [vmem:[#allocation5 + $0x3cc] ss:$16 sps:$4 sm:$0xff]  }
 0x2ae   :  { %2459 = vmatprep.subr.bf16.mxu0 %v5122_v52  ;;  %2545 = vmatprep.subr.bf16.mxu1 %v5125_v0  ;;  %v5198_v55 = vld [vmem:[#allocation5 + $0x3c0] ss:$16 sps:$4 sm:$0xff]   ;;  %v5201_v57 = vld [vmem:[#allocation5 + $0x3c8] ss:$16 sps:$4 sm:$0xff]   ;;  %v5206_v58 = vld [vmem:[#allocation5 + $0x3e4] ss:$16 sps:$4 sm:$0xff]  }
 0x2af   :  { %v5209_v59 = vld [vmem:[#allocation5 + $0x3ec] ss:$16 sps:$4 sm:$0xff]   ;;  %v5204_v61 = vld [vmem:[#allocation5 + $0x3e0] ss:$16 sps:$4 sm:$0xff]   ;;  %v5207_v29 = vld [vmem:[#allocation5 + $0x3e8] ss:$16 sps:$4 sm:$0xff]  }
 0x2b0   :  { %2460 = vmatpush1.bf16.msra.mxu0 %v5120_v60  ;;  %2546 = vmatpush1.bf16.msra.mxu1 %v5123_v2  ;;  %v5212_v62 = vld [vmem:[#allocation7 + $0x4] ss:$16 sps:$4 sm:$0xff]   ;;  %v5215_v63 = vld [vmem:[#allocation7 + $0xc] ss:$16 sps:$4 sm:$0xff]   ;;  %v5210_v52 = vld [vmem:[#allocation7] ss:$16 sps:$4 sm:$0xff]  }
 0x2b1   :  { %2461 = vmatprep.subr.bf16.mxu0 %v5128_v3  ;;  %2547 = vmatprep.subr.bf16.mxu1 %v5131_v4  ;;  %v5213_v0 = vld [vmem:[#allocation7 + $0x8] ss:$16 sps:$4 sm:$0xff]   ;;  %v5218_v60 = vld [vmem:[#allocation7 + $0x24] ss:$16 sps:$4 sm:$0xff]   ;;  %v5221_v2 = vld [vmem:[#allocation7 + $0x2c] ss:$16 sps:$4 sm:$0xff]  }
 0x2b2   :  { %v5216_v3 = vld [vmem:[#allocation7 + $0x20] ss:$16 sps:$4 sm:$0xff]   ;;  %v5219_v4 = vld [vmem:[#allocation7 + $0x28] ss:$16 sps:$4 sm:$0xff]  }
 0x2b4   :  { %2462 = vmatpush1.bf16.msra.mxu0 %v5126_v56  ;;  %2548 = vmatpush1.bf16.msra.mxu1 %v5129_v5  ;;  %v5224_v56 = vld [vmem:[#allocation7 + $0x44] ss:$16 sps:$4 sm:$0xff]   ;;  %v5227_v5 = vld [vmem:[#allocation7 + $0x4c] ss:$16 sps:$4 sm:$0xff]  }
 0x2b5   :  { %2463 = vmatprep.subr.bf16.mxu0 %v5134_v1  ;;  %2549 = vmatprep.subr.bf16.mxu1 %v5137_v6  ;;  %v5222_v1 = vld [vmem:[#allocation7 + $0x40] ss:$16 sps:$4 sm:$0xff]   ;;  %v5225_v6 = vld [vmem:[#allocation7 + $0x48] ss:$16 sps:$4 sm:$0xff]  }
 0x2b8   :  { %2464 = vmatpush1.bf16.msra.mxu0 %v5132_v8  ;;  %2550 = vmatpush1.bf16.msra.mxu1 %v5135_v9  ;;  %v5230_v8 = vld [vmem:[#allocation7 + $0x64] ss:$16 sps:$4 sm:$0xff]   ;;  %v5233_v9 = vld [vmem:[#allocation7 + $0x6c] ss:$16 sps:$4 sm:$0xff]  }
 0x2b9   :  { %2465 = vmatprep.subr.bf16.mxu0 %v5140_v11  ;;  %2551 = vmatprep.subr.bf16.mxu1 %v5143_v13  ;;  %v5228_v11 = vld [vmem:[#allocation7 + $0x60] ss:$16 sps:$4 sm:$0xff]   ;;  %v5236_v13 = vld [vmem:[#allocation7 + $0x84] ss:$16 sps:$4 sm:$0xff]  }
 0x2bc   :  { %2466 = vmatpush1.bf16.msra.mxu0 %v5138_v14  ;;  %2552 = vmatpush1.bf16.msra.mxu1 %v5141_v16  ;;  %v5239_v14 = vld [vmem:[#allocation7 + $0x8c] ss:$16 sps:$4 sm:$0xff]   ;;  %v5234_v16 = vld [vmem:[#allocation7 + $0x80] ss:$16 sps:$4 sm:$0xff]  }
 0x2bd   :  { %2467 = vmatprep.subr.bf16.mxu0 %v5146_v17  ;;  %2553 = vmatprep.subr.bf16.mxu1 %v5149_v18  ;;  %v5237_v17 = vld [vmem:[#allocation7 + $0x88] ss:$16 sps:$4 sm:$0xff]   ;;  %v5242_v18 = vld [vmem:[#allocation7 + $0xa4] ss:$16 sps:$4 sm:$0xff]  }
 0x2c0   :  { %2468 = vmatpush1.bf16.msra.mxu0 %v5144_v19  ;;  %2554 = vmatpush1.bf16.msra.mxu1 %v5147_v20  ;;  %v5245_v19 = vld [vmem:[#allocation7 + $0xac] ss:$16 sps:$4 sm:$0xff]   ;;  %v5240_v20 = vld [vmem:[#allocation7 + $0xa0] ss:$16 sps:$4 sm:$0xff]  }
 0x2c1   :  { %2469 = vmatprep.subr.bf16.mxu0 %v5152_v21  ;;  %2555 = vmatprep.subr.bf16.mxu1 %v5155_v28  ;;  %v5243_v21 = vld [vmem:[#allocation7 + $0xa8] ss:$16 sps:$4 sm:$0xff]   ;;  %v5248_v28 = vld [vmem:[#allocation7 + $0xc4] ss:$16 sps:$4 sm:$0xff]  }
 0x2c4   :  { %2470 = vmatpush1.bf16.msra.mxu0 %v5150_v26  ;;  %2556 = vmatpush1.bf16.msra.mxu1 %v5153_v36  ;;  %v5251_v26 = vld [vmem:[#allocation7 + $0xcc] ss:$16 sps:$4 sm:$0xff]   ;;  %v5246_v36 = vld [vmem:[#allocation7 + $0xc0] ss:$16 sps:$4 sm:$0xff]  }
 0x2c5   :  { %2471 = vmatprep.subr.bf16.mxu0 %v5158_v38  ;;  %2557 = vmatprep.subr.bf16.mxu1 %v5161_v31  ;;  %v5249_v38 = vld [vmem:[#allocation7 + $0xc8] ss:$16 sps:$4 sm:$0xff]   ;;  %v5254_v31 = vld [vmem:[#allocation7 + $0xe4] ss:$16 sps:$4 sm:$0xff]  }
 0x2c8   :  { %2472 = vmatpush1.bf16.msra.mxu0 %v5156_v32  ;;  %2558 = vmatpush1.bf16.msra.mxu1 %v5159_v33  ;;  %v5257_v32 = vld [vmem:[#allocation7 + $0xec] ss:$16 sps:$4 sm:$0xff]   ;;  %v5252_v33 = vld [vmem:[#allocation7 + $0xe0] ss:$16 sps:$4 sm:$0xff]  }
 0x2c9   :  { %2473 = vmatprep.subr.bf16.mxu0 %v5164_v34  ;;  %2559 = vmatprep.subr.bf16.mxu1 %v5167_v39  ;;  %v5255_v34 = vld [vmem:[#allocation7 + $0xe8] ss:$16 sps:$4 sm:$0xff]   ;;  %v5260_v39 = vld [vmem:[#allocation7 + $0x104] ss:$16 sps:$4 sm:$0xff]  }
 0x2cc   :  { %2474 = vmatpush1.bf16.msra.mxu0 %v5162_v42  ;;  %2560 = vmatpush1.bf16.msra.mxu1 %v5165_v22  ;;  %v5263_v42 = vld [vmem:[#allocation7 + $0x10c] ss:$16 sps:$4 sm:$0xff]   ;;  %v5258_v22 = vld [vmem:[#allocation7 + $0x100] ss:$16 sps:$4 sm:$0xff]  }
 0x2cd   :  { %2475 = vmatprep.subr.bf16.mxu0 %v5170_v40  ;;  %2561 = vmatprep.subr.bf16.mxu1 %v5173_v15  ;;  %v5261_v40 = vld [vmem:[#allocation7 + $0x108] ss:$16 sps:$4 sm:$0xff]   ;;  %v5266_v15 = vld [vmem:[#allocation7 + $0x124] ss:$16 sps:$4 sm:$0xff]  }
 0x2d0   :  { %2476 = vmatpush1.bf16.msra.mxu0 %v5168_v41  ;;  %2562 = vmatpush1.bf16.msra.mxu1 %v5171_v23  ;;  %v5269_v41 = vld [vmem:[#allocation7 + $0x12c] ss:$16 sps:$4 sm:$0xff]   ;;  %v5264_v23 = vld [vmem:[#allocation7 + $0x120] ss:$16 sps:$4 sm:$0xff]  }
 0x2d1   :  { %2477 = vmatprep.subr.bf16.mxu0 %v5176_v43  ;;  %2563 = vmatprep.subr.bf16.mxu1 %v5179_v30  ;;  %v5267_v43 = vld [vmem:[#allocation7 + $0x128] ss:$16 sps:$4 sm:$0xff]   ;;  %v5272_v30 = vld [vmem:[#allocation7 + $0x144] ss:$16 sps:$4 sm:$0xff]  }
 0x2d4   :  { %2478 = vmatpush1.bf16.msra.mxu0 %v5174_v44  ;;  %2564 = vmatpush1.bf16.msra.mxu1 %v5177_v10  ;;  %v5275_v44 = vld [vmem:[#allocation7 + $0x14c] ss:$16 sps:$4 sm:$0xff]   ;;  %v5270_v10 = vld [vmem:[#allocation7 + $0x140] ss:$16 sps:$4 sm:$0xff]  }
 0x2d5   :  { %2479 = vmatprep.subr.bf16.mxu0 %v5182_v45  ;;  %2565 = vmatprep.subr.bf16.mxu1 %v5185_v46  ;;  %v5273_v45 = vld [vmem:[#allocation7 + $0x148] ss:$16 sps:$4 sm:$0xff]   ;;  %v5278_v46 = vld [vmem:[#allocation7 + $0x164] ss:$16 sps:$4 sm:$0xff]  }
 0x2d8   :  { %2480 = vmatpush1.bf16.msra.mxu0 %v5180_v47  ;;  %2566 = vmatpush1.bf16.msra.mxu1 %v5183_v25  ;;  %v5281_v47 = vld [vmem:[#allocation7 + $0x16c] ss:$16 sps:$4 sm:$0xff]   ;;  %v5276_v25 = vld [vmem:[#allocation7 + $0x160] ss:$16 sps:$4 sm:$0xff]  }
 0x2d9   :  { %2481 = vmatprep.subr.bf16.mxu0 %v5188_v48  ;;  %2567 = vmatprep.subr.bf16.mxu1 %v5191_v24  ;;  %v5279_v48 = vld [vmem:[#allocation7 + $0x168] ss:$16 sps:$4 sm:$0xff]   ;;  %v5284_v24 = vld [vmem:[#allocation7 + $0x184] ss:$16 sps:$4 sm:$0xff]  }
 0x2dc   :  { %2482 = vmatpush1.bf16.msra.mxu0 %v5186_v49  ;;  %2568 = vmatpush1.bf16.msra.mxu1 %v5189_v35  ;;  %v5287_v49 = vld [vmem:[#allocation7 + $0x18c] ss:$16 sps:$4 sm:$0xff]   ;;  %v5282_v35 = vld [vmem:[#allocation7 + $0x180] ss:$16 sps:$4 sm:$0xff]  }
 0x2dd   :  { %2483 = vmatprep.subr.bf16.mxu0 %v5194_v50  ;;  %2569 = vmatprep.subr.bf16.mxu1 %v5197_v51  ;;  %v5285_v50 = vld [vmem:[#allocation7 + $0x188] ss:$16 sps:$4 sm:$0xff]   ;;  %v5290_v51 = vld [vmem:[#allocation7 + $0x1a4] ss:$16 sps:$4 sm:$0xff]  }
 0x2e0   :  { %2484 = vmatpush1.bf16.msra.mxu0 %v5192_v12  ;;  %2570 = vmatpush1.bf16.msra.mxu1 %v5195_v53  ;;  %v5293_v12 = vld [vmem:[#allocation7 + $0x1ac] ss:$16 sps:$4 sm:$0xff]   ;;  %v5288_v53 = vld [vmem:[#allocation7 + $0x1a0] ss:$16 sps:$4 sm:$0xff]  }
 0x2e1   :  { %2485 = vmatprep.subr.bf16.mxu0 %v5200_v54  ;;  %2571 = vmatprep.subr.bf16.mxu1 %v5203_v27  ;;  %v5291_v54 = vld [vmem:[#allocation7 + $0x1a8] ss:$16 sps:$4 sm:$0xff]   ;;  %v5296_v27 = vld [vmem:[#allocation7 + $0x1c4] ss:$16 sps:$4 sm:$0xff]  }
 0x2e4   :  { %2486 = vmatpush1.bf16.msra.mxu0 %v5198_v55  ;;  %2572 = vmatpush1.bf16.msra.mxu1 %v5201_v57  ;;  %v5299_v55 = vld [vmem:[#allocation7 + $0x1cc] ss:$16 sps:$4 sm:$0xff]   ;;  %v5294_v57 = vld [vmem:[#allocation7 + $0x1c0] ss:$16 sps:$4 sm:$0xff]  }
 0x2e5   :  { %2487 = vmatprep.subr.bf16.mxu0 %v5206_v58  ;;  %2573 = vmatprep.subr.bf16.mxu1 %v5209_v59  ;;  %v5297_v58 = vld [vmem:[#allocation7 + $0x1c8] ss:$16 sps:$4 sm:$0xff]   ;;  %v5300_v59 = vld [vmem:[#allocation7 + $0x1e0] ss:$16 sps:$4 sm:$0xff]  }
 0x2e8   :  { %2488 = vmatpush1.bf16.msra.mxu0 %v5204_v61  ;;  %2574 = vmatpush1.bf16.msra.mxu1 %v5207_v29  ;;  %v5302_v61 = vld [vmem:[#allocation7 + $0x1e4] ss:$16 sps:$4 sm:$0xff]   ;;  %v5303_v29 = vld [vmem:[#allocation7 + $0x1e8] ss:$16 sps:$4 sm:$0xff]  }
 0x2e9   :  { %3526 = vmatprep.subr.bf16.mxu0 %v5212_v62  ;;  %3612 = vmatprep.subr.bf16.mxu1 %v5215_v63  ;;  %v5305_v62 = vld [vmem:[#allocation7 + $0x1ec] ss:$16 sps:$4 sm:$0xff]   ;;  %v5308_v63 = vld [vmem:[#allocation7 + $0x204] ss:$16 sps:$4 sm:$0xff]  }
 0x2eb   :  { %2490 = vmatmul.mubr.bf16.vlgmr.msra.gmra.mrb[8].mxu0 %v5919_v37  ;;  %2576 = vmatmul.mubr.bf16.vlgmr.msra.gmra.mrb[8].mxu1 %v5919_v37  ;;  %v5231_v37 = vld [vmem:[#allocation7 + $0x68] ss:$16 sps:$4 sm:$0xff]  }
 0x2ec   :  { %3527 = vmatpush1.bf16.msra.mxu0 %v5210_v52  ;;  %3613 = vmatpush1.bf16.msra.mxu1 %v5213_v0  ;;  %v5311_v52 = vld [vmem:[#allocation7 + $0x20c] ss:$16 sps:$4 sm:$0xff]  }
 0x2ed   :  { %3528 = vmatprep.subr.bf16.mxu0 %v5218_v60  ;;  %3614 = vmatprep.subr.bf16.mxu1 %v5221_v2 }
 0x2f0   :  { %3529 = vmatpush1.bf16.msra.mxu0 %v5216_v3  ;;  %3615 = vmatpush1.bf16.msra.mxu1 %v5219_v4 }
 0x2f1   :  { %3530 = vmatprep.subr.bf16.mxu0 %v5224_v56  ;;  %3616 = vmatprep.subr.bf16.mxu1 %v5227_v5 }
 0x2f4   :  { %3531 = vmatpush1.bf16.msra.mxu0 %v5222_v1  ;;  %3617 = vmatpush1.bf16.msra.mxu1 %v5225_v6 }
 0x2f5   :  { %3532 = vmatprep.subr.bf16.mxu0 %v5230_v8  ;;  %3618 = vmatprep.subr.bf16.mxu1 %v5233_v9 }
 0x2f8   :  { %3533 = vmatpush1.bf16.msra.mxu0 %v5228_v11  ;;  %3619 = vmatpush1.bf16.msra.mxu1 %v5231_v37 }
 0x2f9   :  { %3534 = vmatprep.subr.bf16.mxu0 %v5236_v13  ;;  %3620 = vmatprep.subr.bf16.mxu1 %v5239_v14 }
 0x2fc   :  { %3535 = vmatpush1.bf16.msra.mxu0 %v5234_v16  ;;  %3621 = vmatpush1.bf16.msra.mxu1 %v5237_v17 }
 0x2fd   :  { %3536 = vmatprep.subr.bf16.mxu0 %v5242_v18  ;;  %3622 = vmatprep.subr.bf16.mxu1 %v5245_v19 }
 0x300   :  { %3537 = vmatpush1.bf16.msra.mxu0 %v5240_v20  ;;  %3623 = vmatpush1.bf16.msra.mxu1 %v5243_v21 }
 0x301   :  { %3538 = vmatprep.subr.bf16.mxu0 %v5248_v28  ;;  %3624 = vmatprep.subr.bf16.mxu1 %v5251_v26 }
 0x304   :  { %3539 = vmatpush1.bf16.msra.mxu0 %v5246_v36  ;;  %3625 = vmatpush1.bf16.msra.mxu1 %v5249_v38 }
 0x305   :  { %3540 = vmatprep.subr.bf16.mxu0 %v5254_v31  ;;  %3626 = vmatprep.subr.bf16.mxu1 %v5257_v32 }
 0x308   :  { %3541 = vmatpush1.bf16.msra.mxu0 %v5252_v33  ;;  %3627 = vmatpush1.bf16.msra.mxu1 %v5255_v34 }
 0x309   :  { %3542 = vmatprep.subr.bf16.mxu0 %v5260_v39  ;;  %3628 = vmatprep.subr.bf16.mxu1 %v5263_v42 }
 0x30c   :  { %3543 = vmatpush1.bf16.msra.mxu0 %v5258_v22  ;;  %3629 = vmatpush1.bf16.msra.mxu1 %v5261_v40 }
 0x30d   :  { %3544 = vmatprep.subr.bf16.mxu0 %v5266_v15  ;;  %3630 = vmatprep.subr.bf16.mxu1 %v5269_v41 }
 0x310   :  { %3545 = vmatpush1.bf16.msra.mxu0 %v5264_v23  ;;  %3631 = vmatpush1.bf16.msra.mxu1 %v5267_v43 }
 0x311   :  { %3546 = vmatprep.subr.bf16.mxu0 %v5272_v30  ;;  %3632 = vmatprep.subr.bf16.mxu1 %v5275_v44 }
 0x314   :  { %3547 = vmatpush1.bf16.msra.mxu0 %v5270_v10  ;;  %3633 = vmatpush1.bf16.msra.mxu1 %v5273_v45 }
 0x315   :  { %3548 = vmatprep.subr.bf16.mxu0 %v5278_v46  ;;  %3634 = vmatprep.subr.bf16.mxu1 %v5281_v47 }
 0x318   :  { %3549 = vmatpush1.bf16.msra.mxu0 %v5276_v25  ;;  %3635 = vmatpush1.bf16.msra.mxu1 %v5279_v48 }
 0x319   :  { %3550 = vmatprep.subr.bf16.mxu0 %v5284_v24  ;;  %3636 = vmatprep.subr.bf16.mxu1 %v5287_v49 }
 0x31c   :  { %3551 = vmatpush1.bf16.msra.mxu0 %v5282_v35  ;;  %3637 = vmatpush1.bf16.msra.mxu1 %v5285_v50 }
 0x31d   :  { %3552 = vmatprep.subr.bf16.mxu0 %v5290_v51  ;;  %3638 = vmatprep.subr.bf16.mxu1 %v5293_v12 }
 0x320   :  { %3553 = vmatpush1.bf16.msra.mxu0 %v5288_v53  ;;  %3639 = vmatpush1.bf16.msra.mxu1 %v5291_v54 }
 0x321   :  { %3554 = vmatprep.subr.bf16.mxu0 %v5296_v27  ;;  %3640 = vmatprep.subr.bf16.mxu1 %v5299_v55 }
 0x324   :  { %3555 = vmatpush1.bf16.msra.mxu0 %v5294_v57  ;;  %3641 = vmatpush1.bf16.msra.mxu1 %v5297_v58 }
 0x325   :  { %3556 = vmatprep.subr.bf16.mxu0 %v5302_v61  ;;  %3642 = vmatprep.subr.bf16.mxu1 %v5305_v62 }
 0x328   :  { %3557 = vmatpush1.bf16.msra.mxu0 %v5300_v59  ;;  %3643 = vmatpush1.bf16.msra.mxu1 %v5303_v29 }
 0x329   :  { %3569 = vmatprep.subr.bf16.mxu0 %v5308_v63  ;;  %3655 = vmatprep.subr.bf16.mxu1 %v5311_v52 }
 0x3be   :  { %v5923_v0 = vpop.f32.mrb[8].mxu0  ;;  %v5925_v60 = vpop.f32.mrb[8].mxu1 }
 0x3bf   :  { %v5927_v2 = vpop.f32.mrb[9].mxu0  ;;  %v5929_v3 = vpop.f32.mrb[9].mxu1  ;;  %v2618_v4 = vmul.f32 %v5923_v0, %v5923_v0  ;;  %v2620_v56 = vmul.f32 %v5925_v60, %v5925_v60 }
 0x3c0   :  { %v2619_v5 = vmul.f32 %v5927_v2, %v5927_v2  ;;  %v2621_v1 = vmul.f32 %v5929_v3, %v5929_v3  ;;  %v5939_v6 = vpop.f32.mrb[10].mxu0  ;;  %v5941_v8 = vpop.f32.mrb[10].mxu1 }
 0x3c1   :  { %v2586_v9 = vadd.f32 %v5939_v6, %v5923_v0  ;;  %v2622_v11 = vmul.f32 %v5939_v6, %v5939_v6  ;;  %v2600_v37 = vadd.f32 %v5941_v8, %v5925_v60  ;;  %v2624_v13 = vmul.f32 %v5941_v8, %v5941_v8  ;;  %v5951_v14 = vpop.f32.mrb[11].mxu0  ;;  %v5953_v16 = vpop.f32.mrb[11].mxu1 }
 0x3c2   :  { %v2593_v17 = vadd.f32 %v5951_v14, %v5927_v2  ;;  %v2623_v18 = vmul.f32 %v5951_v14, %v5951_v14  ;;  %v2607_v19 = vadd.f32 %v5953_v16, %v5929_v3  ;;  %v2625_v20 = vmul.f32 %v5953_v16, %v5953_v16 }
 0x3c3   :  { %v2587_v21 = vrot.slane %v2586_v9, 4  ;;  %v2626_v28 = vadd.f32 %v2622_v11, %v2618_v4  ;;  %v2601_v26 = vrot.slane %v2600_v37, 4  ;;  %v2640_v36 = vadd.f32 %v2624_v13, %v2620_v56 }
 0x3c4   :  { %v2594_v38 = vrot.slane %v2593_v17, 4  ;;  %v2633_v31 = vadd.f32 %v2623_v18, %v2619_v5  ;;  %v2608_v32 = vrot.slane %v2607_v19, 4  ;;  %v2647_v33 = vadd.f32 %v2625_v20, %v2621_v1 }
 0x3c5   :  { %v2588_v34 = vadd.f32 %v2587_v21, %v2586_v9  ;;  %v2627_v39 = vrot.slane %v2626_v28, 4  ;;  %v2602_v42 = vadd.f32 %v2601_v26, %v2600_v37  ;;  %v2641_v22 = vrot.slane %v2640_v36, 4 }
 0x3c6   :  { %v2595_v40 = vadd.f32 %v2594_v38, %v2593_v17  ;;  %v2634_v15 = vrot.slane %v2633_v31, 4  ;;  %v2609_v41 = vadd.f32 %v2608_v32, %v2607_v19  ;;  %v2648_v23 = vrot.slane %v2647_v33, 4 }
 0x3c7   :  { %v2589_v43 = vrot.slane %v2588_v34, 2  ;;  %v2628_v30 = vadd.f32 %v2627_v39, %v2626_v28  ;;  %v2603_v44 = vrot.slane %v2602_v42, 2  ;;  %v2642_v10 = vadd.f32 %v2641_v22, %v2640_v36 }
 0x3c8   :  { %v2596_v45 = vrot.slane %v2595_v40, 2  ;;  %v2635_v46 = vadd.f32 %v2634_v15, %v2633_v31  ;;  %v2610_v47 = vrot.slane %v2609_v41, 2  ;;  %v2649_v25 = vadd.f32 %v2648_v23, %v2647_v33 }
 0x3c9   :  { %v2590_v48 = vadd.f32 %v2589_v43, %v2588_v34  ;;  %v2629_v24 = vrot.slane %v2628_v30, 2  ;;  %v2604_v49 = vadd.f32 %v2603_v44, %v2602_v42  ;;  %v2643_v35 = vrot.slane %v2642_v10, 2 }
 0x3ca   :  { %v2597_v50 = vadd.f32 %v2596_v45, %v2595_v40  ;;  %v2636_v51 = vrot.slane %v2635_v46, 2  ;;  %v2611_v12 = vadd.f32 %v2610_v47, %v2609_v41  ;;  %v2650_v53 = vrot.slane %v2649_v25, 2  ;;  %v5967_v45 = vld [vmem:[%s6180_s6] sm:$0xff] }
 0x3cb   :  { %v2591_v54 = vrot.slane %v2590_v48, 1  ;;  %v2630_v27 = vadd.f32 %v2629_v24, %v2628_v30  ;;  %v2605_v55 = vrot.slane %v2604_v49, 1  ;;  %v2644_v57 = vadd.f32 %v2643_v35, %v2642_v10 }
 0x3cc   :  { %v2598_v58 = vrot.slane %v2597_v50, 1  ;;  %v2637_v59 = vadd.f32 %v2636_v51, %v2635_v46  ;;  %v2612_v61 = vrot.slane %v2611_v12, 1  ;;  %v2651_v29 = vadd.f32 %v2650_v53, %v2649_v25  ;;  %v5973_v25 = vld [vmem:[%s6180_s6 + $0x10] sm:$0xff] }
 0x3cd   :  { %v2592_v62 = vadd.f32 %v2591_v54, %v2590_v48  ;;  %v2631_v63 = vrot.slane %v2630_v27, 1  ;;  %v2606_v52 = vadd.f32 %v2605_v55, %v2604_v49  ;;  %v2645_v4 = vrot.slane %v2644_v57, 1 }
 0x3ce   :  { %v2599_v56 = vadd.f32 %v2598_v58, %v2597_v50  ;;  %v2638_v5 = vrot.slane %v2637_v59, 1  ;;  %v2613_v1 = vadd.f32 %v2612_v61, %v2611_v12  ;;  %v2652_v9 = vrot.slane %v2651_v29, 1  ;;  %v5979_v50 = vld [vmem:[%s6180_s6 + $0x8] sm:$0xff] }
 0x3cf   :  { %v2614_v11 = vmul.f32 0.0625, %v2592_v62  ;;  %v2632_v37 = vadd.f32 %v2631_v63, %v2630_v27  ;;  %v2616_v13 = vmul.f32 0.0625, %v2606_v52  ;;  %v2646_v17 = vadd.f32 %v2645_v4, %v2644_v57  ;;  %v5986_v27 = vld [vmem:[%s6180_s6 + $0x18] sm:$0xff] }
 0x3d0   :  { %v2615_v18 = vmul.f32 0.0625, %v2599_v56  ;;  %v2639_v19 = vadd.f32 %v2638_v5, %v2637_v59  ;;  %v2617_v20 = vmul.f32 0.0625, %v2613_v1  ;;  %v2653_v21 = vadd.f32 %v2652_v9, %v2651_v29 }
 0x3d1   :  { %v2654_v28 = vmul.f32 0.0625, %v2632_v37  ;;  %v2658_v26 = vmul.f32 %v2614_v11, %v2614_v11  ;;  %v2656_v36 = vmul.f32 0.0625, %v2646_v17  ;;  %v2660_v38 = vmul.f32 %v2616_v13, %v2616_v13 }
 0x3d2   :  { %v2655_v31 = vmul.f32 0.0625, %v2639_v19  ;;  %v2659_v32 = vmul.f32 %v2615_v18, %v2615_v18  ;;  %v2657_v33 = vmul.f32 0.0625, %v2653_v21  ;;  %v2661_v34 = vmul.f32 %v2617_v20, %v2617_v20 }
 0x3d3   :  { %v2662_v39 = vsub.f32 %v2654_v28, %v2658_v26  ;;  %v2664_v42 = vsub.f32 %v2656_v36, %v2660_v38  ;;  %v2700_v30 = vsub.s32 2, %v5817_v7  ;;  %v2724_v12 = vsub.s32 6, %v5817_v7 }
 0x3d4   :  { %v2663_v22 = vsub.f32 %v2655_v31, %v2659_v32  ;;  %v2665_v40 = vsub.f32 %v2657_v33, %v2661_v34 }
 0x3d5   :  { %v2666_v15 = vadd.f32 1e-05, %v2662_v39  ;;  %v2668_v41 = vadd.f32 1e-05, %v2664_v42 }
 0x3d6   :  { %v2667_v23 = vadd.f32 1e-05, %v2663_v22  ;;  %v2669_v43 = vadd.f32 1e-05, %v2665_v40 }
 0x3d7   :  { %5450 = vrsqrt.f32 %v2666_v15  ;;  %v5306_v15 = vld [vmem:[#allocation7 + $0x200] ss:$16 sps:$4 sm:$0xff]  }
 0x3d8   :  { %5452 = vrsqrt.f32 %v2668_v41  ;;  %v5309_v41 = vld [vmem:[#allocation7 + $0x208] ss:$16 sps:$4 sm:$0xff]  }
 0x3d9   :  { %5454 = vrsqrt.f32 %v2667_v23 }
 0x3da   :  { %5456 = vrsqrt.f32 %v2669_v43 }
 0x3e1   :  { %v5451_v44 = vpop.eup %5450 }
 0x3e2   :  { %v5453_v10 = vpop.eup %5452  ;;  %v2674_v46 = vmul.f32 %v5967_v45, %v5451_v44  ;;  %v5314_v44 = vld [vmem:[#allocation7 + $0x224] ss:$16 sps:$4 sm:$0xff]  }
 0x3e3   :  { %v5455_v47 = vpop.eup %5454  ;;  %v2676_v48 = vmul.f32 %v5973_v25, %v5453_v10  ;;  %v5317_v10 = vld [vmem:[#allocation7 + $0x22c] ss:$16 sps:$4 sm:$0xff]  }
 0x3e4   :  { %v5457_v24 = vpop.eup %5456  ;;  %v2678_v49 = vmul.f32 %v2674_v46, %v2614_v11  ;;  %v2701_v35 = vrot.slane %v2674_v46, %v2700_v30  ;;  %v2675_v51 = vmul.f32 %v5979_v50, %v5455_v47  ;;  %v5312_v46 = vld [vmem:[#allocation7 + $0x220] ss:$16 sps:$4 sm:$0xff]   ;;  %v5315_v47 = vld [vmem:[#allocation7 + $0x228] ss:$16 sps:$4 sm:$0xff]  }
 0x3e5   :  { %v2680_v53 = vmul.f32 %v2676_v48, %v2616_v13  ;;  %v2709_v54 = vrot.slane %v2676_v48, %v2700_v30  ;;  %v2677_v55 = vmul.f32 %v5986_v27, %v5457_v24  ;;  %v5320_v48 = vld [vmem:[#allocation7 + $0x244] ss:$16 sps:$4 sm:$0xff]   ;;  %v5323_v24 = vld [vmem:[#allocation7 + $0x24c] ss:$16 sps:$4 sm:$0xff]  }
 0x3e6   :  { %v2686_v57 = vrot.slane %v2678_v49, 4  ;;  %v2714_v58 = vmul.f32 %v2701_v35, %v5923_v0  ;;  %v2718_v59 = vmul.f32 %v2701_v35, %v5939_v6  ;;  %v2679_v61 = vmul.f32 %v2675_v51, %v2615_v18  ;;  %v5318_v49 = vld [vmem:[#allocation7 + $0x240] ss:$16 sps:$4 sm:$0xff]   ;;  %v5321_v35 = vld [vmem:[#allocation7 + $0x248] ss:$16 sps:$4 sm:$0xff]  }
 0x3e7   :  { %v2688_v29 = vrot.slane %v2680_v53, 4  ;;  %v2716_v62 = vmul.f32 %v2709_v54, %v5925_v60  ;;  %v2720_v63 = vmul.f32 %v2709_v54, %v5941_v8  ;;  %v2705_v52 = vrot.slane %v2675_v51, %v2700_v30  ;;  %v5326_v51 = vld [vmem:[#allocation7 + $0x264] ss:$16 sps:$4 sm:$0xff]   ;;  %v5324_v53 = vld [vmem:[#allocation7 + $0x260] ss:$16 sps:$4 sm:$0xff]  }
 0x3e8   :  { %v2694_v4 = vsub.f32 %v5967_v45, %v2686_v57  ;;  %v2687_v56 = vrot.slane %v2679_v61, 4  ;;  %v2681_v5 = vmul.f32 %v2677_v55, %v2617_v20  ;;  %v2713_v1 = vrot.slane %v2677_v55, %v2700_v30  ;;  %v5327_v54 = vld [vmem:[#allocation7 + $0x268] ss:$16 sps:$4 sm:$0xff]   ;;  %v5332_v55 = vld [vmem:[#allocation7 + $0x284] ss:$16 sps:$4 sm:$0xff]  }
 0x3e9   :  { %v2696_v9 = vsub.f32 %v5973_v25, %v2688_v29  ;;  %v2715_v11 = vmul.f32 %v2705_v52, %v5927_v2  ;;  %v2719_v0 = vmul.f32 %v2705_v52, %v5951_v14  ;;  %v5335_v57 = vld [vmem:[#allocation7 + $0x28c] ss:$16 sps:$4 sm:$0xff]   ;;  %v5338_v61 = vld [vmem:[#allocation7 + $0x2a4] ss:$16 sps:$4 sm:$0xff]  }
 0x3ea   :  { %v2725_v37 = vrot.slane %v2694_v4, %v2724_v12  ;;  %v2695_v6 = vsub.f32 %v5979_v50, %v2687_v56  ;;  %v2689_v13 = vrot.slane %v2681_v5, 4  ;;  %v2717_v60 = vmul.f32 %v2713_v1, %v5929_v3  ;;  %v5341_v29 = vld [vmem:[#allocation7 + $0x2ac] ss:$16 sps:$4 sm:$0xff]   ;;  %v5344_v52 = vld [vmem:[#allocation7 + $0x2c4] ss:$16 sps:$4 sm:$0xff]  }
 0x3eb   :  { %v2733_v17 = vrot.slane %v2696_v9, %v2724_v12  ;;  %v2721_v8 = vmul.f32 %v2713_v1, %v5953_v16  ;;  %v5347_v4 = vld [vmem:[#allocation7 + $0x2cc] ss:$16 sps:$4 sm:$0xff]   ;;  %v5342_v56 = vld [vmem:[#allocation7 + $0x2c0] ss:$16 sps:$4 sm:$0xff]   ;;  %v5345_v5 = vld [vmem:[#allocation7 + $0x2c8] ss:$16 sps:$4 sm:$0xff]  }
 0x3ec   :  { %v2738_v18 = vadd.f32 %v2725_v37, %v2714_v58  ;;  %v2742_v19 = vadd.f32 %v2725_v37, %v2718_v59  ;;  %v2729_v21 = vrot.slane %v2695_v6, %v2724_v12  ;;  %v2697_v20 = vsub.f32 %v5986_v27, %v2689_v13  ;;  %v5330_v58 = vld [vmem:[#allocation7 + $0x280] ss:$16 sps:$4 sm:$0xff]   ;;  %v5333_v59 = vld [vmem:[#allocation7 + $0x288] ss:$16 sps:$4 sm:$0xff]   ;;  %v5350_v1 = vld [vmem:[#allocation7 + $0x2e4] ss:$16 sps:$4 sm:$0xff]  }
 0x3ed   :  { %v2740_v28 = vadd.f32 %v2733_v17, %v2716_v62  ;;  %v2744_v26 = vadd.f32 %v2733_v17, %v2720_v63  ;;  %v5336_v62 = vld [vmem:[#allocation7 + $0x2a0] ss:$16 sps:$4 sm:$0xff]   ;;  %v5339_v63 = vld [vmem:[#allocation7 + $0x2a8] ss:$16 sps:$4 sm:$0xff]   ;;  %v5353_v9 = vld [vmem:[#allocation7 + $0x2ec] ss:$16 sps:$4 sm:$0xff]  }
 0x3ee   :  { %v2750_v36 = vmax.f32 %v2742_v19, 0.0  ;;  %v2743_v2 = vadd.f32 %v2729_v21, %v2719_v0  ;;  %v2737_v38 = vrot.slane %v2697_v20, %v2724_v12  ;;  %v2739_v14 = vadd.f32 %v2729_v21, %v2715_v11  ;;  %v5329_v12 = vld [vmem:[#allocation7 + $0x26c] ss:$16 sps:$4 sm:$0xff]   ;;  %v5348_v11 = vld [vmem:[#allocation7 + $0x2e0] ss:$16 sps:$4 sm:$0xff]  }
 0x3ef   :  { %v2752_v31 = vmax.f32 %v2744_v26, 0.0  ;;  %v2746_v32 = vmax.f32 %v2738_v18, 0.0  ;;  %v2748_v33 = vmax.f32 %v2740_v28, 0.0  ;;  %v5351_v0 = vld [vmem:[#allocation7 + $0x2e8] ss:$16 sps:$4 sm:$0xff]  }
 0x3f0   :  { %v2745_v34 = vadd.f32 %v2737_v38, %v2721_v8  ;;  %v2747_v39 = vmax.f32 %v2739_v14, 0.0  ;;  %v2751_v3 = vmax.f32 %v2743_v2, 0.0  ;;  %v2741_v42 = vadd.f32 %v2737_v38, %v2717_v60  ;;  %v5356_v37 = vld [vmem:[#allocation7 + $0x304] ss:$16 sps:$4 sm:$0xff]   ;;  %v5359_v6 = vld [vmem:[#allocation7 + $0x30c] ss:$16 sps:$4 sm:$0xff]  }
 0x3f1   :  { %v2754_v22 = vpack.c.bf16 %v2750_v36, %v2746_v32  ;;  %v6001_v16 = vpack.c.bf16 %v2752_v31, %v2748_v33  ;;  %v5354_v13 = vld [vmem:[#allocation7 + $0x300] ss:$16 sps:$4 sm:$0xff]   ;;  %v5357_v60 = vld [vmem:[#allocation7 + $0x308] ss:$16 sps:$4 sm:$0xff]   ;;  %v5362_v17 = vld [vmem:[#allocation7 + $0x324] ss:$16 sps:$4 sm:$0xff]  }
 0x3f2   :  { %v2755_v40 = vpack.c.bf16 %v2751_v3, %v2747_v39  ;;  %v2749_v23 = vmax.f32 %v2741_v42, 0.0  ;;  %v2753_v43 = vmax.f32 %v2745_v34, 0.0  ;;  %v5365_v8 = vld [vmem:[#allocation7 + $0x32c] ss:$16 sps:$4 sm:$0xff]   ;;  %v5360_v18 = vld [vmem:[#allocation7 + $0x320] ss:$16 sps:$4 sm:$0xff]  }
 0x3f3   :  { %v5363_v19 = vld [vmem:[#allocation7 + $0x328] ss:$16 sps:$4 sm:$0xff]   ;;  %v5368_v21 = vld [vmem:[#allocation7 + $0x344] ss:$16 sps:$4 sm:$0xff]   ;;  %v5371_v20 = vld [vmem:[#allocation7 + $0x34c] ss:$16 sps:$4 sm:$0xff]  }
 0x3f4   :  { %3558 = vmatprep.mubr.bf16.mxu0 %v2755_v40  ;;  %3644 = vmatprep.mubr.bf16.mxu1 %v2755_v40  ;;  %v2757_v30 = vpack.c.bf16 %v2753_v43, %v2749_v23  ;;  %v5366_v28 = vld [vmem:[#allocation7 + $0x340] ss:$16 sps:$4 sm:$0xff]   ;;  %v5369_v26 = vld [vmem:[#allocation7 + $0x348] ss:$16 sps:$4 sm:$0xff]   ;;  %v5374_v36 = vld [vmem:[#allocation7 + $0x364] ss:$16 sps:$4 sm:$0xff]  }
 0x3f5   :  { %3559 = vmatmul.mubr.bf16.vlgmr.msra.gmra.mrb[12].mxu0 %v2754_v22  ;;  %3645 = vmatmul.mubr.bf16.vlgmr.msra.gmra.mrb[12].mxu1 %v2754_v22  ;;  %v5377_v2 = vld [vmem:[#allocation7 + $0x36c] ss:$16 sps:$4 sm:$0xff]   ;;  %v5372_v38 = vld [vmem:[#allocation7 + $0x360] ss:$16 sps:$4 sm:$0xff]   ;;  %v5375_v14 = vld [vmem:[#allocation7 + $0x368] ss:$16 sps:$4 sm:$0xff]  }
 0x3f6   :  { %3570 = vmatpush1.bf16.msra.mxu0 %v5306_v15  ;;  %3656 = vmatpush1.bf16.msra.mxu1 %v5309_v41  ;;  %v5380_v31 = vld [vmem:[#allocation7 + $0x384] ss:$16 sps:$4 sm:$0xff]   ;;  %v5383_v32 = vld [vmem:[#allocation7 + $0x38c] ss:$16 sps:$4 sm:$0xff]   ;;  %v5378_v33 = vld [vmem:[#allocation7 + $0x380] ss:$16 sps:$4 sm:$0xff]  }
 0x3f7   :  { %3601 = vmatprep.mubr.bf16.mxu0 %v2757_v30  ;;  %3687 = vmatprep.mubr.bf16.mxu1 %v2757_v30  ;;  %v5381_v34 = vld [vmem:[#allocation7 + $0x388] ss:$16 sps:$4 sm:$0xff]   ;;  %v5386_v39 = vld [vmem:[#allocation7 + $0x3a4] ss:$16 sps:$4 sm:$0xff]   ;;  %v5389_v3 = vld [vmem:[#allocation7 + $0x3ac] ss:$16 sps:$4 sm:$0xff]  }
 0x3f8   :  { %3571 = vmatprep.subr.bf16.mxu0 %v5314_v44  ;;  %3657 = vmatprep.subr.bf16.mxu1 %v5317_v10  ;;  %v5384_v42 = vld [vmem:[#allocation7 + $0x3a0] ss:$16 sps:$4 sm:$0xff]   ;;  %v5387_v22 = vld [vmem:[#allocation7 + $0x3a8] ss:$16 sps:$4 sm:$0xff]   ;;  %v5392_v40 = vld [vmem:[#allocation7 + $0x3c4] ss:$16 sps:$4 sm:$0xff]  }
 0x3f9   :  { %v5395_v15 = vld [vmem:[#allocation7 + $0x3cc] ss:$16 sps:$4 sm:$0xff]   ;;  %v5390_v41 = vld [vmem:[#allocation7 + $0x3c0] ss:$16 sps:$4 sm:$0xff]   ;;  %v5393_v23 = vld [vmem:[#allocation7 + $0x3c8] ss:$16 sps:$4 sm:$0xff]  }
 0x3fa   :  { %3572 = vmatpush1.bf16.msra.mxu0 %v5312_v46  ;;  %3658 = vmatpush1.bf16.msra.mxu1 %v5315_v47  ;;  %v5398_v43 = vld [vmem:[#allocation7 + $0x3e4] ss:$16 sps:$4 sm:$0xff]   ;;  %v5401_v30 = vld [vmem:[#allocation7 + $0x3ec] ss:$16 sps:$4 sm:$0xff]   ;;  %v5396_v44 = vld [vmem:[#allocation7 + $0x3e0] ss:$16 sps:$4 sm:$0xff]  }
 0x3fb   :  { %3573 = vmatprep.subr.bf16.mxu0 %v5320_v48  ;;  %3659 = vmatprep.subr.bf16.mxu1 %v5323_v24  ;;  %v5399_v10 = vld [vmem:[#allocation7 + $0x3e8] ss:$16 sps:$4 sm:$0xff]   ;;  %v5402_v46 = vld [vmem:[%s6179_s5 + $0x40] sm:$0xff]  }
 0x3fc   :  { %v5403_v47 = vld [vmem:[%s6179_s5 + $0xc0] sm:$0xff]  }
 0x3fd   :  { %v5404_v48 = vld [vmem:[%s6179_s5] sm:$0xff]  }
 0x3fe   :  { %3574 = vmatpush1.bf16.msra.mxu0 %v5318_v49  ;;  %3660 = vmatpush1.bf16.msra.mxu1 %v5321_v35  ;;  %v5405_v24 = vld [vmem:[%s6179_s5 + $0x80] sm:$0xff]   ;;  %v5407_v49 = vld [vmem:[%s6179_s5 + $0xc8] sm:$0xff]  }
 0x3ff   :  { %3575 = vmatprep.subr.bf16.mxu0 %v5326_v51  ;;  %3661 = vmatprep.subr.bf16.mxu1 %v5329_v12  ;;  %v5408_v35 = vld [vmem:[%s6179_s5 + $0x8] sm:$0xff]   ;;  %v5410_v12 = vld [vmem:[%s6179_s5 + $0x50] sm:$0xff]  }
 0x400   :  { %v5409_v51 = vld [vmem:[%s6179_s5 + $0x88] sm:$0xff]  }
 0x402   :  { %3576 = vmatpush1.bf16.msra.mxu0 %v5324_v53  ;;  %3662 = vmatpush1.bf16.msra.mxu1 %v5327_v54  ;;  %v5411_v53 = vld [vmem:[%s6179_s5 + $0xd0] sm:$0xff]  }
 0x403   :  { %3577 = vmatprep.subr.bf16.mxu0 %v5332_v55  ;;  %3663 = vmatprep.subr.bf16.mxu1 %v5335_v57  ;;  %v5412_v54 = vld [vmem:[%s6179_s5 + $0x10] sm:$0xff]   ;;  %v5414_v57 = vld [vmem:[%s6179_s5 + $0x58] sm:$0xff]  }
 0x404   :  { %v5413_v55 = vld [vmem:[%s6179_s5 + $0x90] sm:$0xff]  }
 0x406   :  { %3578 = vmatpush1.bf16.msra.mxu0 %v5330_v58  ;;  %3664 = vmatpush1.bf16.msra.mxu1 %v5333_v59  ;;  %v5415_v58 = vld [vmem:[%s6179_s5 + $0xd8] sm:$0xff]  }
 0x407   :  { %3579 = vmatprep.subr.bf16.mxu0 %v5338_v61  ;;  %3665 = vmatprep.subr.bf16.mxu1 %v5341_v29  ;;  %v5416_v59 = vld [vmem:[%s6179_s5 + $0x18] sm:$0xff]   ;;  %v5418_v29 = vld [vmem:[%s6179_s5 + $0x60] sm:$0xff]  }
 0x408   :  { %v5417_v61 = vld [vmem:[%s6179_s5 + $0x98] sm:$0xff]  }
 0x40a   :  { %3580 = vmatpush1.bf16.msra.mxu0 %v5336_v62  ;;  %3666 = vmatpush1.bf16.msra.mxu1 %v5339_v63  ;;  %v5419_v62 = vld [vmem:[%s6179_s5 + $0xe0] sm:$0xff]  }
 0x40b   :  { %3581 = vmatprep.subr.bf16.mxu0 %v5344_v52  ;;  %3667 = vmatprep.subr.bf16.mxu1 %v5347_v4  ;;  %v5420_v63 = vld [vmem:[%s6179_s5 + $0x20] sm:$0xff]   ;;  %v5422_v4 = vld [vmem:[%s6179_s5 + $0x68] sm:$0xff]  }
 0x40c   :  { %v5421_v52 = vld [vmem:[%s6179_s5 + $0xa0] sm:$0xff]  }
 0x40e   :  { %3582 = vmatpush1.bf16.msra.mxu0 %v5342_v56  ;;  %3668 = vmatpush1.bf16.msra.mxu1 %v5345_v5  ;;  %v5423_v56 = vld [vmem:[%s6179_s5 + $0xe8] sm:$0xff]  }
 0x40f   :  { %3583 = vmatprep.subr.bf16.mxu0 %v5350_v1  ;;  %3669 = vmatprep.subr.bf16.mxu1 %v5353_v9  ;;  %v5424_v5 = vld [vmem:[%s6179_s5 + $0x28] sm:$0xff]   ;;  %v5426_v9 = vld [vmem:[%s6179_s5 + $0x70] sm:$0xff]  }
 0x410   :  { %v5425_v1 = vld [vmem:[%s6179_s5 + $0xa8] sm:$0xff]  }
 0x412   :  { %3584 = vmatpush1.bf16.msra.mxu0 %v5348_v11  ;;  %3670 = vmatpush1.bf16.msra.mxu1 %v5351_v0  ;;  %v5427_v11 = vld [vmem:[%s6179_s5 + $0xf0] sm:$0xff]  }
 0x413   :  { %3585 = vmatprep.subr.bf16.mxu0 %v5356_v37  ;;  %3671 = vmatprep.subr.bf16.mxu1 %v5359_v6  ;;  %v5428_v0 = vld [vmem:[%s6179_s5 + $0x30] sm:$0xff]   ;;  %v5430_v6 = vld [vmem:[%s6179_s5 + $0x78] sm:$0xff]  }
 0x414   :  { %v5429_v37 = vld [vmem:[%s6179_s5 + $0xb0] sm:$0xff]  }
 0x416   :  { %3586 = vmatpush1.bf16.msra.mxu0 %v5354_v13  ;;  %3672 = vmatpush1.bf16.msra.mxu1 %v5357_v60  ;;  %v5431_v13 = vld [vmem:[%s6179_s5 + $0xf8] sm:$0xff]  }
 0x417   :  { %3587 = vmatprep.subr.bf16.mxu0 %v5362_v17  ;;  %3673 = vmatprep.subr.bf16.mxu1 %v5365_v8  ;;  %v5432_v60 = vld [vmem:[%s6179_s5 + $0x38] sm:$0xff]  }
 0x418   :  { %v5433_v17 = vld [vmem:[%s6179_s5 + $0xb8] sm:$0xff]  }
 0x41a   :  { %3588 = vmatpush1.bf16.msra.mxu0 %v5360_v18  ;;  %3674 = vmatpush1.bf16.msra.mxu1 %v5363_v19 }
 0x41b   :  { %3589 = vmatprep.subr.bf16.mxu0 %v5368_v21  ;;  %3675 = vmatprep.subr.bf16.mxu1 %v5371_v20 }
 0x41e   :  { %3590 = vmatpush1.bf16.msra.mxu0 %v5366_v28  ;;  %3676 = vmatpush1.bf16.msra.mxu1 %v5369_v26 }
 0x41f   :  { %3591 = vmatprep.subr.bf16.mxu0 %v5374_v36  ;;  %3677 = vmatprep.subr.bf16.mxu1 %v5377_v2 }
 0x422   :  { %3592 = vmatpush1.bf16.msra.mxu0 %v5372_v38  ;;  %3678 = vmatpush1.bf16.msra.mxu1 %v5375_v14 }
 0x423   :  { %3593 = vmatprep.subr.bf16.mxu0 %v5380_v31  ;;  %3679 = vmatprep.subr.bf16.mxu1 %v5383_v32 }
 0x426   :  { %3594 = vmatpush1.bf16.msra.mxu0 %v5378_v33  ;;  %3680 = vmatpush1.bf16.msra.mxu1 %v5381_v34 }
 0x427   :  { %3595 = vmatprep.subr.bf16.mxu0 %v5386_v39  ;;  %3681 = vmatprep.subr.bf16.mxu1 %v5389_v3 }
 0x42a   :  { %3596 = vmatpush1.bf16.msra.mxu0 %v5384_v42  ;;  %3682 = vmatpush1.bf16.msra.mxu1 %v5387_v22 }
 0x42b   :  { %3597 = vmatprep.subr.bf16.mxu0 %v5392_v40  ;;  %3683 = vmatprep.subr.bf16.mxu1 %v5395_v15 }
 0x42e   :  { %3598 = vmatpush1.bf16.msra.mxu0 %v5390_v41  ;;  %3684 = vmatpush1.bf16.msra.mxu1 %v5393_v23 }
 0x42f   :  { %3599 = vmatprep.subr.bf16.mxu0 %v5398_v43  ;;  %3685 = vmatprep.subr.bf16.mxu1 %v5401_v30 }
 0x432   :  { %3600 = vmatpush1.bf16.msra.mxu0 %v5396_v44  ;;  %3686 = vmatpush1.bf16.msra.mxu1 %v5399_v10 }
 0x433   :  { %4700 = vmatprep.subr.bf16.mxu0 %v5402_v46  ;;  %4722 = vmatprep.subr.bf16.mxu1 %v5403_v47 }
 0x435   :  { %3602 = vmatmul.mubr.bf16.vlgmr.msra.gmra.mrb[12].mxu0 %v6001_v16  ;;  %3688 = vmatmul.mubr.bf16.vlgmr.msra.gmra.mrb[12].mxu1 %v6001_v16  ;;  %v5406_v16 = vld [vmem:[%s6179_s5 + $0x48] sm:$0xff]  }
 0x436   :  { %4701 = vmatpush3.bf16.msra.mxu0 %v5404_v48  ;;  %4723 = vmatpush3.bf16.msra.mxu1 %v5405_v24 }
 0x437   :  { %4702 = vmatprep.subr.bf16.mxu0 %v5406_v16  ;;  %4724 = vmatprep.subr.bf16.mxu1 %v5407_v49 }
 0x43a   :  { %4703 = vmatpush3.bf16.msra.mxu0 %v5408_v35  ;;  %4725 = vmatpush3.bf16.msra.mxu1 %v5409_v51 }
 0x43b   :  { %4704 = vmatprep.subr.bf16.mxu0 %v5410_v12  ;;  %4726 = vmatprep.subr.bf16.mxu1 %v5411_v53 }
 0x43e   :  { %4705 = vmatpush3.bf16.msra.mxu0 %v5412_v54  ;;  %4727 = vmatpush3.bf16.msra.mxu1 %v5413_v55 }
 0x43f   :  { %4706 = vmatprep.subr.bf16.mxu0 %v5414_v57  ;;  %4728 = vmatprep.subr.bf16.mxu1 %v5415_v58 }
 0x442   :  { %4707 = vmatpush3.bf16.msra.mxu0 %v5416_v59  ;;  %4729 = vmatpush3.bf16.msra.mxu1 %v5417_v61 }
 0x443   :  { %4708 = vmatprep.subr.bf16.mxu0 %v5418_v29  ;;  %4730 = vmatprep.subr.bf16.mxu1 %v5419_v62 }
 0x446   :  { %4709 = vmatpush3.bf16.msra.mxu0 %v5420_v63  ;;  %4731 = vmatpush3.bf16.msra.mxu1 %v5421_v52 }
 0x447   :  { %4710 = vmatprep.subr.bf16.mxu0 %v5422_v4  ;;  %4732 = vmatprep.subr.bf16.mxu1 %v5423_v56 }
 0x44a   :  { %4711 = vmatpush3.bf16.msra.mxu0 %v5424_v5  ;;  %4733 = vmatpush3.bf16.msra.mxu1 %v5425_v1 }
 0x44b   :  { %4712 = vmatprep.subr.bf16.mxu0 %v5426_v9  ;;  %4734 = vmatprep.subr.bf16.mxu1 %v5427_v11 }
 0x44e   :  { %4713 = vmatpush3.bf16.msra.mxu0 %v5428_v0  ;;  %4735 = vmatpush3.bf16.msra.mxu1 %v5429_v37 }
 0x44f   :  { %4714 = vmatprep.subr.bf16.mxu0 %v5430_v6  ;;  %4736 = vmatprep.subr.bf16.mxu1 %v5431_v13 }
 0x452   :  { %4715 = vmatpush3.bf16.msra.mxu0 %v5432_v60  ;;  %4737 = vmatpush3.bf16.msra.mxu1 %v5433_v17 }
 0x508   :  { %v6101_v8 = vpop.f32.mrb[12].mxu0  ;;  %v6103_v18 = vpop.f32.mrb[12].mxu1 }
 0x509   :  { %v6105_v19 = vpop.f32.mrb[13].mxu0  ;;  %v6107_v21 = vpop.f32.mrb[13].mxu1  ;;  %v3730_v20 = vmul.f32 %v6101_v8, %v6101_v8  ;;  %v3732_v28 = vmul.f32 %v6103_v18, %v6103_v18 }
 0x50a   :  { %v3731_v26 = vmul.f32 %v6105_v19, %v6105_v19  ;;  %v3733_v36 = vmul.f32 %v6107_v21, %v6107_v21  ;;  %v6117_v2 = vpop.f32.mrb[14].mxu0  ;;  %v6119_v38 = vpop.f32.mrb[14].mxu1 }
 0x50b   :  { %v3698_v14 = vadd.f32 %v6117_v2, %v6101_v8  ;;  %v3734_v31 = vmul.f32 %v6117_v2, %v6117_v2  ;;  %v3712_v32 = vadd.f32 %v6119_v38, %v6103_v18  ;;  %v3736_v33 = vmul.f32 %v6119_v38, %v6119_v38  ;;  %v6129_v34 = vpop.f32.mrb[15].mxu0  ;;  %v6131_v39 = vpop.f32.mrb[15].mxu1 }
 0x50c   :  { %v3705_v3 = vadd.f32 %v6129_v34, %v6105_v19  ;;  %v3735_v42 = vmul.f32 %v6129_v34, %v6129_v34  ;;  %v3719_v22 = vadd.f32 %v6131_v39, %v6107_v21  ;;  %v3737_v40 = vmul.f32 %v6131_v39, %v6131_v39 }
 0x50d   :  { %v3699_v15 = vrot.slane %v3698_v14, 4  ;;  %v3738_v41 = vadd.f32 %v3734_v31, %v3730_v20  ;;  %v3713_v23 = vrot.slane %v3712_v32, 4  ;;  %v3752_v43 = vadd.f32 %v3736_v33, %v3732_v28 }
 0x50e   :  { %v3706_v30 = vrot.slane %v3705_v3, 4  ;;  %v3745_v44 = vadd.f32 %v3735_v42, %v3731_v26  ;;  %v3720_v10 = vrot.slane %v3719_v22, 4  ;;  %v3759_v46 = vadd.f32 %v3737_v40, %v3733_v36 }
 0x50f   :  { %v3700_v47 = vadd.f32 %v3699_v15, %v3698_v14  ;;  %v3739_v48 = vrot.slane %v3738_v41, 4  ;;  %v3714_v24 = vadd.f32 %v3713_v23, %v3712_v32  ;;  %v3753_v16 = vrot.slane %v3752_v43, 4 }
 0x510   :  { %v3707_v49 = vadd.f32 %v3706_v30, %v3705_v3  ;;  %v3746_v35 = vrot.slane %v3745_v44, 4  ;;  %v3721_v51 = vadd.f32 %v3720_v10, %v3719_v22  ;;  %v3760_v12 = vrot.slane %v3759_v46, 4 }
 0x511   :  { %v3701_v53 = vrot.slane %v3700_v47, 2  ;;  %v3740_v54 = vadd.f32 %v3739_v48, %v3738_v41  ;;  %v3715_v55 = vrot.slane %v3714_v24, 2  ;;  %v3754_v57 = vadd.f32 %v3753_v16, %v3752_v43 }
 0x512   :  { %v3708_v58 = vrot.slane %v3707_v49, 2  ;;  %v3747_v59 = vadd.f32 %v3746_v35, %v3745_v44  ;;  %v3722_v61 = vrot.slane %v3721_v51, 2  ;;  %v3761_v29 = vadd.f32 %v3760_v12, %v3759_v46 }
 0x513   :  { %v3702_v62 = vadd.f32 %v3701_v53, %v3700_v47  ;;  %v3741_v63 = vrot.slane %v3740_v54, 2  ;;  %v3716_v52 = vadd.f32 %v3715_v55, %v3714_v24  ;;  %v3755_v4 = vrot.slane %v3754_v57, 2 }
 0x514   :  { %v3709_v56 = vadd.f32 %v3708_v58, %v3707_v49  ;;  %v3748_v5 = vrot.slane %v3747_v59, 2  ;;  %v3723_v1 = vadd.f32 %v3722_v61, %v3721_v51  ;;  %v3762_v9 = vrot.slane %v3761_v29, 2 }
 0x515   :  { %v3703_v11 = vrot.slane %v3702_v62, 1  ;;  %v3742_v0 = vadd.f32 %v3741_v63, %v3740_v54  ;;  %v3717_v37 = vrot.slane %v3716_v52, 1  ;;  %v3756_v6 = vadd.f32 %v3755_v4, %v3754_v57 }
 0x516   :  { %v3710_v13 = vrot.slane %v3709_v56, 1  ;;  %v3749_v60 = vadd.f32 %v3748_v5, %v3747_v59  ;;  %v3724_v17 = vrot.slane %v3723_v1, 1  ;;  %v3763_v20 = vadd.f32 %v3762_v9, %v3761_v29 }
 0x517   :  { %v3704_v28 = vadd.f32 %v3703_v11, %v3702_v62  ;;  %v3743_v26 = vrot.slane %v3742_v0, 1  ;;  %v3718_v36 = vadd.f32 %v3717_v37, %v3716_v52  ;;  %v3757_v14 = vrot.slane %v3756_v6, 1 }
 0x518   :  { %v3711_v31 = vadd.f32 %v3710_v13, %v3709_v56  ;;  %v3750_v32 = vrot.slane %v3749_v60, 1  ;;  %v3725_v33 = vadd.f32 %v3724_v17, %v3723_v1  ;;  %v3764_v3 = vrot.slane %v3763_v20, 1 }
 0x519   :  { %v3726_v42 = vmul.f32 0.0625, %v3704_v28  ;;  %v3744_v22 = vadd.f32 %v3743_v26, %v3742_v0  ;;  %v3728_v40 = vmul.f32 0.0625, %v3718_v36  ;;  %v3758_v15 = vadd.f32 %v3757_v14, %v3756_v6 }
 0x51a   :  { %v3727_v41 = vmul.f32 0.0625, %v3711_v31  ;;  %v3751_v23 = vadd.f32 %v3750_v32, %v3749_v60  ;;  %v3729_v43 = vmul.f32 0.0625, %v3725_v33  ;;  %v3765_v30 = vadd.f32 %v3764_v3, %v3763_v20 }
 0x51b   :  { %v3766_v44 = vmul.f32 0.0625, %v3744_v22  ;;  %v3770_v10 = vmul.f32 %v3726_v42, %v3726_v42  ;;  %v3768_v46 = vmul.f32 0.0625, %v3758_v15  ;;  %v3772_v47 = vmul.f32 %v3728_v40, %v3728_v40 }
 0x51c   :  { %v3767_v48 = vmul.f32 0.0625, %v3751_v23  ;;  %v3771_v24 = vmul.f32 %v3727_v41, %v3727_v41  ;;  %v3769_v16 = vmul.f32 0.0625, %v3765_v30  ;;  %v3773_v49 = vmul.f32 %v3729_v43, %v3729_v43 }
 0x51d   :  { %v3774_v35 = vsub.f32 %v3766_v44, %v3770_v10  ;;  %v3776_v51 = vsub.f32 %v3768_v46, %v3772_v47  ;;  %v3812_v59 = vsub.s32 3, %v5817_v7  ;;  %v3836_v9 = vsub.s32 7, %v5817_v7 }
 0x51e   :  { %v3775_v12 = vsub.f32 %v3767_v48, %v3771_v24  ;;  %v3777_v53 = vsub.f32 %v3769_v16, %v3773_v49 }
 0x51f   :  { %v3778_v54 = vadd.f32 1e-05, %v3774_v35  ;;  %v3780_v55 = vadd.f32 1e-05, %v3776_v51 }
 0x520   :  { %v3779_v57 = vadd.f32 1e-05, %v3775_v12  ;;  %v3781_v58 = vadd.f32 1e-05, %v3777_v53  ;;  %v4665_v53 = vld [vmem:[%s6181_s7] ss:$0 sm:$0xff] }
 0x521   :  { %5458 = vrsqrt.f32 %v3778_v54  ;;  %s5578_s7 = smov [#allocation8]  }
 0x522   :  { %5460 = vrsqrt.f32 %v3780_v55  ;;  %s4235_s9 = sshll.u32 %s5578_s7, 4  ;;  %s4236_s9 = int_to_ptr.vmem [resolvable:$true] %s4235_s9 }
 0x523   :  { %5462 = vrsqrt.f32 %v3779_v57  ;;  %s5544_s10 = scalar_lea.vmem %s4236_s9, 256  ;;  %p5549_p11 = scmp.lt.s32.totalorder %s4236_s9, %s4236_s9 }
 0x524   :  { %5464 = vrsqrt.f32 %v3781_v58  ;;  %p5545_p10 = scmp.ne.s32.totalorder %s4236_s9, %s5544_s10  ;;  %p5550_p12 = scmp.lt.s32.totalorder %s5544_s10, %s5544_s10 }
 0x526   :  { %p5551_p13 = por %p5550_p12, %p5549_p11 }
 0x528   :  { %p5552_p0 = pnand %p5551_p13, %p5545_p10 }
 0x52b   :  { %v5459_v61 = vpop.eup %5458 }
 0x52c   :  { %v5461_v29 = vpop.eup %5460  ;;  %v3786_v62 = vmul.f32 %v5967_v45, %v5459_v61 }
 0x52d   :  { %v5463_v63 = vpop.eup %5462  ;;  %v3788_v52 = vmul.f32 %v5973_v25, %v5461_v29 }
 0x52e   :  { %v5465_v4 = vpop.eup %5464  ;;  %v3790_v56 = vmul.f32 %v3786_v62, %v3726_v42  ;;  %v3813_v5 = vrot.slane %v3786_v62, %v3812_v59  ;;  %v3787_v1 = vmul.f32 %v5979_v50, %v5463_v63 }
 0x52f   :  { %v3792_v11 = vmul.f32 %v3788_v52, %v3728_v40  ;;  %v3821_v0 = vrot.slane %v3788_v52, %v3812_v59  ;;  %v3789_v37 = vmul.f32 %v5986_v27, %v5465_v4 }
 0x530   :  { %v3798_v6 = vrot.slane %v3790_v56, 4  ;;  %v3826_v13 = vmul.f32 %v3813_v5, %v6101_v8  ;;  %v3830_v60 = vmul.f32 %v3813_v5, %v6117_v2  ;;  %v3791_v17 = vmul.f32 %v3787_v1, %v3727_v41 }
 0x531   :  { %v3800_v20 = vrot.slane %v3792_v11, 4  ;;  %v3828_v28 = vmul.f32 %v3821_v0, %v6103_v18  ;;  %v3832_v26 = vmul.f32 %v3821_v0, %v6119_v38  ;;  %v3817_v36 = vrot.slane %v3787_v1, %v3812_v59 }
 0x532   :  { %v3806_v14 = vsub.f32 %v5967_v45, %v3798_v6  ;;  %v3799_v31 = vrot.slane %v3791_v17, 4  ;;  %v3793_v7 = vmul.f32 %v3789_v37, %v3729_v43  ;;  %v3825_v32 = vrot.slane %v3789_v37, %v3812_v59 }
 0x533   :  { %v3808_v33 = vsub.f32 %v5973_v25, %v3800_v20  ;;  %v3827_v3 = vmul.f32 %v3817_v36, %v6105_v19  ;;  %v3831_v8 = vmul.f32 %v3817_v36, %v6129_v34 }
 0x534   :  { %v3837_v42 = vrot.slane %v3806_v14, %v3836_v9  ;;  %v3807_v2 = vsub.f32 %v5979_v50, %v3799_v31  ;;  %v3801_v22 = vrot.slane %v3793_v7, 4  ;;  %v3829_v18 = vmul.f32 %v3825_v32, %v6107_v21 }
 0x535   :  { %v3845_v40 = vrot.slane %v3808_v33, %v3836_v9  ;;  %v3833_v38 = vmul.f32 %v3825_v32, %v6131_v39 }
 0x536   :  { %v3850_v15 = vadd.f32 %v3837_v42, %v3826_v13  ;;  %v3854_v45 = vadd.f32 %v3837_v42, %v3830_v60  ;;  %v3841_v41 = vrot.slane %v3807_v2, %v3836_v9  ;;  %v3809_v23 = vsub.f32 %v5986_v27, %v3801_v22 }
 0x537   :  { %v3852_v43 = vadd.f32 %v3845_v40, %v3828_v28  ;;  %v3856_v25 = vadd.f32 %v3845_v40, %v3832_v26 }
 0x538   :  { %v3862_v30 = vmax.f32 %v3854_v45, 0.0  ;;  %v3855_v19 = vadd.f32 %v3841_v41, %v3831_v8  ;;  %v3849_v44 = vrot.slane %v3809_v23, %v3836_v9  ;;  %v3851_v34 = vadd.f32 %v3841_v41, %v3827_v3 }
 0x539   :  { %v3864_v10 = vmax.f32 %v3856_v25, 0.0  ;;  %v3858_v46 = vmax.f32 %v3850_v15, 0.0  ;;  %v3860_v50 = vmax.f32 %v3852_v43, 0.0 }
 0x53a   :  { %v3857_v47 = vadd.f32 %v3849_v44, %v3833_v38  ;;  %v3859_v48 = vmax.f32 %v3851_v34, 0.0  ;;  %v3863_v21 = vmax.f32 %v3855_v19, 0.0  ;;  %v3853_v24 = vadd.f32 %v3849_v44, %v3829_v18 }
 0x53b   :  { %v3866_v16 = vpack.c.bf16 %v3862_v30, %v3858_v46  ;;  %v3868_v39 = vpack.c.bf16 %v3864_v10, %v3860_v50 }
 0x53c   :  { %v3867_v49 = vpack.c.bf16 %v3863_v21, %v3859_v48  ;;  %v3861_v35 = vmax.f32 %v3853_v24, 0.0  ;;  %v3865_v51 = vmax.f32 %v3857_v47, 0.0 }
 0x53e   :  { %4165 = vmatprep.mubr.bf16.mxu0 %v3867_v49  ;;  %v3869_v27 = vpack.c.bf16 %v3865_v51, %v3861_v35 }
 0x53f   :  { %4166 = vmatmul.mubr.bf16.vlgmr.msra.gmra.mrb[16].mxu0 %v3866_v16 }
 0x540   :  { %4206 = vmatprep.mubr.bf16.mxu1 %v3869_v27 }
 0x541   :  { %4207 = vmatmul.mubr.bf16.vlgmr.msra.gmra.mrb[16].mxu1 %v3868_v39 }
 0x612   :  { %v4716_v12 = vpop.f32.mrb[16].mxu0 }
 0x613   :  { %v4717_v54 = vpop.f32.mrb[17].mxu0 }
 0x614   :  { %v4738_v55 = vpop.f32.mrb[16].mxu1  ;;  %v4718_v57 = vadd.f32 %v4717_v54, %v4716_v12  ;;  %v4719_v58 = vpop.f32.mrb[18].mxu0 }
 0x615   :  { %v4739_v59 = vpop.f32.mrb[17].mxu1  ;;  %v4720_v61 = vpop.f32.mrb[19].mxu0 }
 0x616   :  { %v4168_v29 = vadd.f32 %v4718_v57, %v4665_v53  ;;  %v4740_v62 = vadd.f32 %v4739_v59, %v4738_v55  ;;  %v4741_v63 = vpop.f32.mrb[18].mxu1  ;;  %v4721_v52 = vadd.f32 %v4720_v61, %v4719_v58 }
 0x617   :  { %v4742_v4 = vpop.f32.mrb[19].mxu1 }
 0x618   :  { %v4209_v56 = vadd.f32 %v4740_v62, %v4168_v29  ;;  %v4171_v5 = vadd.f32 %v4721_v52, %v4665_v53  ;;  %v4743_v1 = vadd.f32 %v4742_v4, %v4741_v63 }
 0x61a   :  { %v4698_v9 = vmul.f32 -1.442695, %v4209_v56  ;;  %v4212_v11 = vadd.f32 %v4743_v1, %v4171_v5 }
 0x61c   :  { %5466 = vpow2.f32 %v4698_v9  ;;  %v4699_v0 = vmul.f32 -1.442695, %v4212_v11 }
 0x61e   :  { %5468 = vpow2.f32 %v4699_v0 }
 0x626   :  { %v5467_v37 = vpop.eup %5466 }
 0x627   :  { %v4221_v6 = vadd.f32 1.0, %v5467_v37 }
 0x628   :  { %v5469_v13 = vpop.eup %5468 }
 0x629   :  { %5470 = vrcp.f32 %v4221_v6  ;;  %v4222_v60 = vadd.f32 1.0, %v5469_v13 }
 0x62b   :  { %5472 = vrcp.f32 %v4222_v60 }
 0x633   :  { %v5471_v17 = vpop.eup %5470 }
 0x634   :  { %4228 = vst.msk [vmem:[#allocation8] sm:$0xff] %vm4227_vm0, %v5471_v17 }
 0x635   :  { %v5473_v20 = vpop.eup %5472 }
 0x636   :  { %4229 = vst.msk [vmem:[#allocation8 + $0x8] sm:$0xff] %vm4227_vm0, %v5473_v20 }
 0x637   :  { %5555 = shalt.err (!%p5552_p0)
}
 0x638   :  { %s5556_s1 = scalar_lea.hbm %s6182_s8, 256 }
 0x639   :  { %p5557_p1 = scmp.ne.s32.totalorder %s6182_s8, %s5556_s1  ;;  %p5560_p2 = scmp.lt.u32.totalorder %s5556_s1, %s6182_s8 }
 0x63b   :  { %p5562_p3 = pnand %p5560_p2, %p5557_p1 }
 0x63d   :  { %5565 = shalt.err (!%p5562_p3)
}
 0x63e   :  { %s5579_s16 = smov 128   ;;  %s5580_s19 = smov 8  }
 0x63f   :  { %4241 = dma.vmem_to_hbm [thread:$0]  %s4236_s9, 256, %s6182_s8, [#allocation4], %s5579_s16, %s5579_s16, %s5580_s19  }
 0x640   :  { %5570 = dma.done.wait [#allocation4], 256  }
 0x641   :  { %5571 = vsyncadd [#allocation4], 4294967040 }
 0x642   :  { %4245 = vsyncpa [#allocation3], 1 }
 0x643   :  { %4246 = vsyncpa [#allocation6], 1 }
 0x644   :  { %4247 = vsyncpa [#allocation4], 1 }

</bundles_post_ra>
